<compile_context>
chip_gen: v5e
topology: v5e:2x2
jax: 0.10.0
libtpu: 0.0.40
codegen_flags: <defaults>
</compile_context>

<pallas_src>
import functools

import jax
import jax.numpy as jnp
from jax.experimental import pallas as pl
from jax.experimental.pallas import tpu as pltpu

EPS = 1e-5


def _full_spec(shape):
    n = len(shape)
    return pl.BlockSpec(shape, lambda i, _n=n: (0,) * _n)


def _round_up(x, m):
    return ((x + m - 1) // m) * m


# ---------------------------------------------------------------------------
# Fused NarrativeGraph kernel
#   edge relation encoding + mean  ->  (+ GRU last hidden)  ->  graph_reasoning
# edges and T are static Python; both loops are unrolled at trace time.
# ---------------------------------------------------------------------------
def _make_narrative_kernel(edges, T, has_temporal):
    def kernel(*refs):
        if has_temporal:
            (nodes_ref, relW_ref, relb_ref,
             xf_ref, wih_ref, whh_ref, bih_ref, bhh_ref,
             w1_ref, b1_ref, g_ref, be_ref, w2_ref, b2_ref, o_ref) = refs
        else:
            (nodes_ref, relW_ref, relb_ref,
             w1_ref, b1_ref, g_ref, be_ref, w2_ref, b2_ref, o_ref) = refs

        Bp = nodes_ref.shape[1]
        H = nodes_ref.shape[2]
        E = len(edges)

        # ---- per-edge relation encoding, accumulated mean (unrolled, static) ----
        acc = jnp.zeros((Bp, H), jnp.float32)
        for (src, rel, dst) in edges:
            s = nodes_ref[src].astype(jnp.float32)          # (Bp, H)
            d = nodes_ref[dst].astype(jnp.float32)          # (Bp, H)
            w = relW_ref[rel]                               # (2H, H)
            b = relb_ref[rel]                               # (1, H)
            # cat([s, d], dim=1) @ W  ==  s @ W[:H] + d @ W[H:]
            acc = acc + (jnp.dot(s, w[:H, :], preferred_element_type=jnp.float32)
                         + jnp.dot(d, w[H:, :], preferred_element_type=jnp.float32)
                         + b)
        graph_state = acc * (1.0 / float(E))

        # ---- GRU temporal encoder, last hidden (h0 = 0) ----
        if has_temporal:
            # Hoisted input projection: one (T*Bp, H) x (H, 3H) matmul.
            gi_all = (jnp.dot(xf_ref[...].astype(jnp.float32), wih_ref[...],
                              preferred_element_type=jnp.float32)
                      + bih_ref[...])                       # (T*Bp, 3H)
            whh = whh_ref[...]
            bhh = bhh_ref[...]
            h = jnp.zeros((Bp, H), jnp.float32)
            for t in range(T):                              # unrolled recurrence
                gi = gi_all[t * Bp:(t + 1) * Bp, :]
                gh = jnp.dot(h, whh, preferred_element_type=jnp.float32) + bhh
                r = jax.nn.sigmoid(gi[:, 0:H] + gh[:, 0:H])
                z = jax.nn.sigmoid(gi[:, H:2 * H] + gh[:, H:2 * H])
                n = jnp.tanh(gi[:, 2 * H:3 * H] + r * gh[:, 2 * H:3 * H])
                h = (1.0 - z) * n + z * h
            graph_state = graph_state + h

        # ---- graph_reasoning: Linear -> LayerNorm -> ReLU -> (Dropout id) -> Linear
        m = jnp.dot(graph_state, w1_ref[...],
                    preferred_element_type=jnp.float32) + b1_ref[...]
        mu = jnp.mean(m, axis=-1, keepdims=True)
        var = jnp.mean((m - mu) ** 2, axis=-1, keepdims=True)
        m = (m - mu) * jax.lax.rsqrt(var + EPS)
        m = m * g_ref[...] + be_ref[...]
        m = jnp.maximum(m, 0.0)                             # ReLU; Dropout = identity
        out = jnp.dot(m, w2_ref[...],
                      preferred_element_type=jnp.float32) + b2_ref[...]
        o_ref[...] = out.astype(o_ref.dtype)

    return kernel


# ---------------------------------------------------------------------------
# Wrapper
# ---------------------------------------------------------------------------
def narrative_graph_forward(params, nodes, edges, temporal_sequence=None):
    """nodes: (num_nodes, B, H); edges: python list of (src, rel_type, dst);
    temporal_sequence: (B, T, H) batch-first or None."""
    H = params["hidden_dim"]
    if len(edges) == 0:
        # Mirror the PyTorch module: returns zeros(nodes.shape[0], hidden_dim).
        return jnp.zeros((nodes.shape[0], H), jnp.float32)

    N, B, _ = nodes.shape
    Bp = _round_up(max(B, 1), 8)                            # sublane-full batch
    if Bp != B:
        nodes_p = jnp.pad(nodes, ((0, 0), (0, Bp - B), (0, 0)))
    else:
        nodes_p = nodes

    has_temporal = temporal_sequence is not None
    args = [nodes_p, params["rel_W"], params["rel_b"]]
    if has_temporal:
        T = temporal_sequence.shape[1]
        x_tbh = jnp.transpose(temporal_sequence, (1, 0, 2))  # (T, B, H)
        if Bp != B:
            x_tbh = jnp.pad(x_tbh, ((0, 0), (0, Bp - B), (0, 0)))
        x_flat = x_tbh.reshape(T * Bp, H)                    # time-major, flattened
        g = params["gru"]
        args += [x_flat, g["wih"], g["whh"], g["bih"], g["bhh"]]
    else:
        T = 0
    w1, b1, gg, bb, w2, b2 = params["graph_reasoning"]
    args += [w1, b1, gg, bb, w2, b2]

    kernel = _make_narrative_kernel(tuple(edges), T, has_temporal)
    out = pl.pallas_call(
        kernel,
        out_shape=jax.ShapeDtypeStruct((Bp, H), jnp.float32),
        grid=(1,),
        in_specs=[_full_spec(a.shape) for a in args],
        out_specs=_full_spec((Bp, H)),
        compiler_params=pltpu.CompilerParams(
            dimension_semantics=("arbitrary",)),
    )(*args)
    return out[:B]


# ---------------------------------------------------------------------------
# Parameters (deterministic)
# ---------------------------------------------------------------------------
def _lin_params(key, din, dout, scale=0.05):
    kw, kb = jax.random.split(key)
    w = jax.random.normal(kw, (din, dout), jnp.float32) * scale
    b = jax.random.normal(kb, (1, dout), jnp.float32) * scale
    return w, b


def init_params(key, hidden_dim, num_relations=8):
    keys = jax.random.split(key, 10)
    p = {"hidden_dim": hidden_dim}
    # relation_encoders: num_relations x Linear(2H -> H)
    p["rel_W"] = jax.random.normal(
        keys[0], (num_relations, 2 * hidden_dim, hidden_dim), jnp.float32) * 0.05
    p["rel_b"] = jax.random.normal(
        keys[1], (num_relations, 1, hidden_dim), jnp.float32) * 0.05
    # temporal_encoder: GRU(H, H), batch_first; PyTorch (r|z|n) packing, transposed.
    p["gru"] = {
        "wih": jax.random.normal(keys[2], (hidden_dim, 3 * hidden_dim), jnp.float32) * 0.05,
        "whh": jax.random.normal(keys[3], (hidden_dim, 3 * hidden_dim), jnp.float32) * 0.05,
        "bih": jax.random.normal(keys[4], (1, 3 * hidden_dim), jnp.float32) * 0.05,
        "bhh": jax.random.normal(keys[5], (1, 3 * hidden_dim), jnp.float32) * 0.05,
    }
    # graph_reasoning: H -> 2H (LayerNorm, ReLU, Dropout-eval) -> H
    w1, b1 = _lin_params(keys[6], hidden_dim, 2 * hidden_dim)
    w2, b2 = _lin_params(keys[7], 2 * hidden_dim, hidden_dim)
    p["graph_reasoning"] = (w1, b1,
                            jnp.ones((1, 2 * hidden_dim), jnp.float32),
                            jnp.zeros((1, 2 * hidden_dim), jnp.float32),
                            w2, b2)
    return p


# ---------------------------------------------------------------------------
# Pure-JAX reference (for a sanity check against the fused kernel)
# ---------------------------------------------------------------------------
def _ref_forward(params, nodes, edges, temporal):
    H = params["hidden_dim"]
    hi = jax.lax.Precision.HIGHEST
    enc = []
    for (src, rel, dst) in edges:
        ei = jnp.concatenate([nodes[src], nodes[dst]], axis=1)
        enc.append(jnp.dot(ei, params["rel_W"][rel], precision=hi)
                   + params["rel_b"][rel][0])
    graph_state = jnp.stack(enc).mean(0)
    if temporal is not None:
        x = jnp.transpose(temporal, (1, 0, 2))
        g = params["gru"]
        h = jnp.zeros((temporal.shape[0], H), jnp.float32)
        for t in range(x.shape[0]):
            gi = jnp.dot(x[t], g["wih"], precision=hi) + g["bih"]
            gh = jnp.dot(h, g["whh"], precision=hi) + g["bhh"]
            r = jax.nn.sigmoid(gi[:, :H] + gh[:, :H])
            z = jax.nn.sigmoid(gi[:, H:2 * H] + gh[:, H:2 * H])
            n = jnp.tanh(gi[:, 2 * H:] + r * gh[:, 2 * H:])
            h = (1.0 - z) * n + z * h
        graph_state = graph_state + h
    w1, b1, gg, bb, w2, b2 = params["graph_reasoning"]
    m = jnp.dot(graph_state, w1, precision=hi) + b1
    mu = m.mean(-1, keepdims=True)
    var = ((m - mu) ** 2).mean(-1, keepdims=True)
    m = (m - mu) * jax.lax.rsqrt(var + EPS) * gg + bb
    m = jnp.maximum(m, 0.0)
    return jnp.dot(m, w2, precision=hi) + b2


# ---------------------------------------------------------------------------
if __name__ == "__main__":
    B = 2
    HIDDEN = 32
    NUM_NODES = 5
    T = 6

    key = jax.random.PRNGKey(0)
    kp, kn, kt = jax.random.split(key, 3)
    params = init_params(kp, HIDDEN)

    nodes = jax.random.normal(kn, (NUM_NODES, B, HIDDEN), jnp.float32)
    temporal = jax.random.normal(kt, (B, T, HIDDEN), jnp.float32)
    edges = [(0, 1, 2), (1, 3, 4), (2, 0, 3), (4, 7, 0)]

    out = narrative_graph_forward(params, nodes, edges, temporal)
    jax.block_until_ready(out)
    assert out.shape == (B, HIDDEN)

    out_nt = narrative_graph_forward(params, nodes, edges, None)
    jax.block_until_ready(out_nt)
    assert out_nt.shape == (B, HIDDEN)

    ref = _ref_forward(params, nodes, edges, temporal)
    ref_nt = _ref_forward(params, nodes, edges, None)
    assert jnp.allclose(out, ref, rtol=1e-3, atol=1e-3)
    assert jnp.allclose(out_nt, ref_nt, rtol=1e-3, atol=1e-3)

    print("KERNEL_OK")
</pallas_src>

<mosaic_0001>
module attributes {stable_mosaic.version = 11 : i64} {
  func.func @kernel(%arg0: i32, %arg1: memref<5x8x32xf32, #tpu.memory_space<vmem>>, %arg2: memref<8x64x32xf32, #tpu.memory_space<vmem>>, %arg3: memref<8x1x32xf32, #tpu.memory_space<vmem>>, %arg4: memref<48x32xf32, #tpu.memory_space<vmem>>, %arg5: memref<32x96xf32, #tpu.memory_space<vmem>>, %arg6: memref<32x96xf32, #tpu.memory_space<vmem>>, %arg7: memref<1x96xf32, #tpu.memory_space<vmem>>, %arg8: memref<1x96xf32, #tpu.memory_space<vmem>>, %arg9: memref<32x64xf32, #tpu.memory_space<vmem>>, %arg10: memref<1x64xf32, #tpu.memory_space<vmem>>, %arg11: memref<1x64xf32, #tpu.memory_space<vmem>>, %arg12: memref<1x64xf32, #tpu.memory_space<vmem>>, %arg13: memref<64x32xf32, #tpu.memory_space<vmem>>, %arg14: memref<1x32xf32, #tpu.memory_space<vmem>>, %arg15: memref<8x32xf32, #tpu.memory_space<vmem>>) attributes {dimension_semantics = [#tpu.dimension_semantics<arbitrary>], iteration_bounds = array<i64: 1>, scalar_prefetch = 0 : i64, scratch_operands = 0 : i64, tpu.core_type = #tpu.core_type<tc>, window_params = [{pipeline_mode = #tpu.pipeline_mode<synchronous>, transform_indices = @transform_0, window_bounds = array<i64: 5, 8, 32>}, {pipeline_mode = #tpu.pipeline_mode<synchronous>, transform_indices = @transform_1, window_bounds = array<i64: 8, 64, 32>}, {pipeline_mode = #tpu.pipeline_mode<synchronous>, transform_indices = @transform_2, window_bounds = array<i64: 8, 1, 32>}, {pipeline_mode = #tpu.pipeline_mode<synchronous>, transform_indices = @transform_3, window_bounds = array<i64: 48, 32>}, {pipeline_mode = #tpu.pipeline_mode<synchronous>, transform_indices = @transform_4, window_bounds = array<i64: 32, 96>}, {pipeline_mode = #tpu.pipeline_mode<synchronous>, transform_indices = @transform_5, window_bounds = array<i64: 32, 96>}, {pipeline_mode = #tpu.pipeline_mode<synchronous>, transform_indices = @transform_6, window_bounds = array<i64: 1, 96>}, {pipeline_mode = #tpu.pipeline_mode<synchronous>, transform_indices = @transform_7, window_bounds = array<i64: 1, 96>}, {pipeline_mode = #tpu.pipeline_mode<synchronous>, transform_indices = @transform_8, window_bounds = array<i64: 32, 64>}, {pipeline_mode = #tpu.pipeline_mode<synchronous>, transform_indices = @transform_9, window_bounds = array<i64: 1, 64>}, {pipeline_mode = #tpu.pipeline_mode<synchronous>, transform_indices = @transform_10, window_bounds = array<i64: 1, 64>}, {pipeline_mode = #tpu.pipeline_mode<synchronous>, transform_indices = @transform_11, window_bounds = array<i64: 1, 64>}, {pipeline_mode = #tpu.pipeline_mode<synchronous>, transform_indices = @transform_12, window_bounds = array<i64: 64, 32>}, {pipeline_mode = #tpu.pipeline_mode<synchronous>, transform_indices = @transform_13, window_bounds = array<i64: 1, 32>}, {pipeline_mode = #tpu.pipeline_mode<synchronous>, transform_indices = @transform_14, window_bounds = array<i64: 8, 32>}]} {
    %cst = arith.constant 0.000000e+00 : f32
    %0 = vector.broadcast %cst : f32 to vector<8x32xf32>
    %c0 = arith.constant 0 : index
    %c0_0 = arith.constant 0 : index
    %c0_1 = arith.constant 0 : index
    %1 = vector.load %arg1[%c0, %c0_0, %c0_1] : memref<5x8x32xf32, #tpu.memory_space<vmem>>, vector<1x8x32xf32>
    %2 = vector.shape_cast %1 : vector<1x8x32xf32> to vector<8x32xf32>
    %c2 = arith.constant 2 : index
    %c0_2 = arith.constant 0 : index
    %c0_3 = arith.constant 0 : index
    %3 = vector.load %arg1[%c2, %c0_2, %c0_3] : memref<5x8x32xf32, #tpu.memory_space<vmem>>, vector<1x8x32xf32>
    %4 = vector.shape_cast %3 : vector<1x8x32xf32> to vector<8x32xf32>
    %c1 = arith.constant 1 : index
    %c0_4 = arith.constant 0 : index
    %c0_5 = arith.constant 0 : index
    %5 = vector.load %arg2[%c1, %c0_4, %c0_5] : memref<8x64x32xf32, #tpu.memory_space<vmem>>, vector<1x64x32xf32>
    %6 = vector.shape_cast %5 : vector<1x64x32xf32> to vector<64x32xf32>
    %c1_6 = arith.constant 1 : index
    %c0_7 = arith.constant 0 : index
    %c0_8 = arith.constant 0 : index
    %7 = vector.load %arg3[%c1_6, %c0_7, %c0_8] : memref<8x1x32xf32, #tpu.memory_space<vmem>>, vector<1x1x32xf32>
    %8 = vector.shape_cast %7 : vector<1x1x32xf32> to vector<1x32xf32>
    %9 = vector.extract_strided_slice %6 {offsets = [0, 0], sizes = [32, 32], strides = [1, 1]} : vector<64x32xf32> to vector<32x32xf32>
    %cst_9 = arith.constant dense<0.000000e+00> : vector<8x32xf32>
    %10 = tpu.matmul %2, %9, %cst_9 {dimension_numbers = #tpu.dot_dimension_numbers<[1], [0], [0], [1], [0, 0, 1, 1], [], []>} : vector<8x32xf32>, vector<32x32xf32>, vector<8x32xf32> -> vector<8x32xf32>
    %11 = vector.extract_strided_slice %6 {offsets = [32, 0], sizes = [32, 32], strides = [1, 1]} : vector<64x32xf32> to vector<32x32xf32>
    %cst_10 = arith.constant dense<0.000000e+00> : vector<8x32xf32>
    %12 = tpu.matmul %4, %11, %cst_10 {dimension_numbers = #tpu.dot_dimension_numbers<[1], [0], [0], [1], [0, 0, 1, 1], [], []>} : vector<8x32xf32>, vector<32x32xf32>, vector<8x32xf32> -> vector<8x32xf32>
    %13 = arith.addf %10, %12 : vector<8x32xf32>
    %14 = vector.broadcast %8 : vector<1x32xf32> to vector<8x32xf32>
    %15 = arith.addf %13, %14 : vector<8x32xf32>
    %16 = arith.addf %0, %15 : vector<8x32xf32>
    %c1_11 = arith.constant 1 : index
    %c0_12 = arith.constant 0 : index
    %c0_13 = arith.constant 0 : index
    %17 = vector.load %arg1[%c1_11, %c0_12, %c0_13] : memref<5x8x32xf32, #tpu.memory_space<vmem>>, vector<1x8x32xf32>
    %18 = vector.shape_cast %17 : vector<1x8x32xf32> to vector<8x32xf32>
    %c4 = arith.constant 4 : index
    %c0_14 = arith.constant 0 : index
    %c0_15 = arith.constant 0 : index
    %19 = vector.load %arg1[%c4, %c0_14, %c0_15] : memref<5x8x32xf32, #tpu.memory_space<vmem>>, vector<1x8x32xf32>
    %20 = vector.shape_cast %19 : vector<1x8x32xf32> to vector<8x32xf32>
    %c3 = arith.constant 3 : index
    %c0_16 = arith.constant 0 : index
    %c0_17 = arith.constant 0 : index
    %21 = vector.load %arg2[%c3, %c0_16, %c0_17] : memref<8x64x32xf32, #tpu.memory_space<vmem>>, vector<1x64x32xf32>
    %22 = vector.shape_cast %21 : vector<1x64x32xf32> to vector<64x32xf32>
    %c3_18 = arith.constant 3 : index
    %c0_19 = arith.constant 0 : index
    %c0_20 = arith.constant 0 : index
    %23 = vector.load %arg3[%c3_18, %c0_19, %c0_20] : memref<8x1x32xf32, #tpu.memory_space<vmem>>, vector<1x1x32xf32>
    %24 = vector.shape_cast %23 : vector<1x1x32xf32> to vector<1x32xf32>
    %25 = vector.extract_strided_slice %22 {offsets = [0, 0], sizes = [32, 32], strides = [1, 1]} : vector<64x32xf32> to vector<32x32xf32>
    %cst_21 = arith.constant dense<0.000000e+00> : vector<8x32xf32>
    %26 = tpu.matmul %18, %25, %cst_21 {dimension_numbers = #tpu.dot_dimension_numbers<[1], [0], [0], [1], [0, 0, 1, 1], [], []>} : vector<8x32xf32>, vector<32x32xf32>, vector<8x32xf32> -> vector<8x32xf32>
    %27 = vector.extract_strided_slice %22 {offsets = [32, 0], sizes = [32, 32], strides = [1, 1]} : vector<64x32xf32> to vector<32x32xf32>
    %cst_22 = arith.constant dense<0.000000e+00> : vector<8x32xf32>
    %28 = tpu.matmul %20, %27, %cst_22 {dimension_numbers = #tpu.dot_dimension_numbers<[1], [0], [0], [1], [0, 0, 1, 1], [], []>} : vector<8x32xf32>, vector<32x32xf32>, vector<8x32xf32> -> vector<8x32xf32>
    %29 = arith.addf %26, %28 : vector<8x32xf32>
    %30 = vector.broadcast %24 : vector<1x32xf32> to vector<8x32xf32>
    %31 = arith.addf %29, %30 : vector<8x32xf32>
    %32 = arith.addf %16, %31 : vector<8x32xf32>
    %c2_23 = arith.constant 2 : index
    %c0_24 = arith.constant 0 : index
    %c0_25 = arith.constant 0 : index
    %33 = vector.load %arg1[%c2_23, %c0_24, %c0_25] : memref<5x8x32xf32, #tpu.memory_space<vmem>>, vector<1x8x32xf32>
    %34 = vector.shape_cast %33 : vector<1x8x32xf32> to vector<8x32xf32>
    %c3_26 = arith.constant 3 : index
    %c0_27 = arith.constant 0 : index
    %c0_28 = arith.constant 0 : index
    %35 = vector.load %arg1[%c3_26, %c0_27, %c0_28] : memref<5x8x32xf32, #tpu.memory_space<vmem>>, vector<1x8x32xf32>
    %36 = vector.shape_cast %35 : vector<1x8x32xf32> to vector<8x32xf32>
    %c0_29 = arith.constant 0 : index
    %c0_30 = arith.constant 0 : index
    %c0_31 = arith.constant 0 : index
    %37 = vector.load %arg2[%c0_29, %c0_30, %c0_31] : memref<8x64x32xf32, #tpu.memory_space<vmem>>, vector<1x64x32xf32>
    %38 = vector.shape_cast %37 : vector<1x64x32xf32> to vector<64x32xf32>
    %c0_32 = arith.constant 0 : index
    %c0_33 = arith.constant 0 : index
    %c0_34 = arith.constant 0 : index
    %39 = vector.load %arg3[%c0_32, %c0_33, %c0_34] : memref<8x1x32xf32, #tpu.memory_space<vmem>>, vector<1x1x32xf32>
    %40 = vector.shape_cast %39 : vector<1x1x32xf32> to vector<1x32xf32>
    %41 = vector.extract_strided_slice %38 {offsets = [0, 0], sizes = [32, 32], strides = [1, 1]} : vector<64x32xf32> to vector<32x32xf32>
    %cst_35 = arith.constant dense<0.000000e+00> : vector<8x32xf32>
    %42 = tpu.matmul %34, %41, %cst_35 {dimension_numbers = #tpu.dot_dimension_numbers<[1], [0], [0], [1], [0, 0, 1, 1], [], []>} : vector<8x32xf32>, vector<32x32xf32>, vector<8x32xf32> -> vector<8x32xf32>
    %43 = vector.extract_strided_slice %38 {offsets = [32, 0], sizes = [32, 32], strides = [1, 1]} : vector<64x32xf32> to vector<32x32xf32>
    %cst_36 = arith.constant dense<0.000000e+00> : vector<8x32xf32>
    %44 = tpu.matmul %36, %43, %cst_36 {dimension_numbers = #tpu.dot_dimension_numbers<[1], [0], [0], [1], [0, 0, 1, 1], [], []>} : vector<8x32xf32>, vector<32x32xf32>, vector<8x32xf32> -> vector<8x32xf32>
    %45 = arith.addf %42, %44 : vector<8x32xf32>
    %46 = vector.broadcast %40 : vector<1x32xf32> to vector<8x32xf32>
    %47 = arith.addf %45, %46 : vector<8x32xf32>
    %48 = arith.addf %32, %47 : vector<8x32xf32>
    %c4_37 = arith.constant 4 : index
    %c0_38 = arith.constant 0 : index
    %c0_39 = arith.constant 0 : index
    %49 = vector.load %arg1[%c4_37, %c0_38, %c0_39] : memref<5x8x32xf32, #tpu.memory_space<vmem>>, vector<1x8x32xf32>
    %50 = vector.shape_cast %49 : vector<1x8x32xf32> to vector<8x32xf32>
    %c0_40 = arith.constant 0 : index
    %c0_41 = arith.constant 0 : index
    %c0_42 = arith.constant 0 : index
    %51 = vector.load %arg1[%c0_40, %c0_41, %c0_42] : memref<5x8x32xf32, #tpu.memory_space<vmem>>, vector<1x8x32xf32>
    %52 = vector.shape_cast %51 : vector<1x8x32xf32> to vector<8x32xf32>
    %c7 = arith.constant 7 : index
    %c0_43 = arith.constant 0 : index
    %c0_44 = arith.constant 0 : index
    %53 = vector.load %arg2[%c7, %c0_43, %c0_44] : memref<8x64x32xf32, #tpu.memory_space<vmem>>, vector<1x64x32xf32>
    %54 = vector.shape_cast %53 : vector<1x64x32xf32> to vector<64x32xf32>
    %c7_45 = arith.constant 7 : index
    %c0_46 = arith.constant 0 : index
    %c0_47 = arith.constant 0 : index
    %55 = vector.load %arg3[%c7_45, %c0_46, %c0_47] : memref<8x1x32xf32, #tpu.memory_space<vmem>>, vector<1x1x32xf32>
    %56 = vector.shape_cast %55 : vector<1x1x32xf32> to vector<1x32xf32>
    %57 = vector.extract_strided_slice %54 {offsets = [0, 0], sizes = [32, 32], strides = [1, 1]} : vector<64x32xf32> to vector<32x32xf32>
    %cst_48 = arith.constant dense<0.000000e+00> : vector<8x32xf32>
    %58 = tpu.matmul %50, %57, %cst_48 {dimension_numbers = #tpu.dot_dimension_numbers<[1], [0], [0], [1], [0, 0, 1, 1], [], []>} : vector<8x32xf32>, vector<32x32xf32>, vector<8x32xf32> -> vector<8x32xf32>
    %59 = vector.extract_strided_slice %54 {offsets = [32, 0], sizes = [32, 32], strides = [1, 1]} : vector<64x32xf32> to vector<32x32xf32>
    %cst_49 = arith.constant dense<0.000000e+00> : vector<8x32xf32>
    %60 = tpu.matmul %52, %59, %cst_49 {dimension_numbers = #tpu.dot_dimension_numbers<[1], [0], [0], [1], [0, 0, 1, 1], [], []>} : vector<8x32xf32>, vector<32x32xf32>, vector<8x32xf32> -> vector<8x32xf32>
    %61 = arith.addf %58, %60 : vector<8x32xf32>
    %62 = vector.broadcast %56 : vector<1x32xf32> to vector<8x32xf32>
    %63 = arith.addf %61, %62 : vector<8x32xf32>
    %64 = arith.addf %48, %63 : vector<8x32xf32>
    %cst_50 = arith.constant 2.500000e-01 : f32
    %65 = vector.broadcast %cst_50 : f32 to vector<8x32xf32>
    %66 = arith.mulf %64, %65 : vector<8x32xf32>
    %c0_51 = arith.constant 0 : index
    %c0_52 = arith.constant 0 : index
    %67 = vector.load %arg4[%c0_51, %c0_52] : memref<48x32xf32, #tpu.memory_space<vmem>>, vector<48x32xf32>
    %c0_53 = arith.constant 0 : index
    %c0_54 = arith.constant 0 : index
    %68 = vector.load %arg5[%c0_53, %c0_54] : memref<32x96xf32, #tpu.memory_space<vmem>>, vector<32x96xf32>
    %cst_55 = arith.constant dense<0.000000e+00> : vector<48x96xf32>
    %69 = tpu.matmul %67, %68, %cst_55 {dimension_numbers = #tpu.dot_dimension_numbers<[1], [0], [0], [1], [0, 0, 1, 1], [], []>} : vector<48x32xf32>, vector<32x96xf32>, vector<48x96xf32> -> vector<48x96xf32>
    %c0_56 = arith.constant 0 : index
    %c0_57 = arith.constant 0 : index
    %70 = vector.load %arg7[%c0_56, %c0_57] : memref<1x96xf32, #tpu.memory_space<vmem>>, vector<1x96xf32>
    %71 = vector.broadcast %70 : vector<1x96xf32> to vector<48x96xf32>
    %72 = arith.addf %69, %71 : vector<48x96xf32>
    %c0_58 = arith.constant 0 : index
    %c0_59 = arith.constant 0 : index
    %73 = vector.load %arg6[%c0_58, %c0_59] : memref<32x96xf32, #tpu.memory_space<vmem>>, vector<32x96xf32>
    %c0_60 = arith.constant 0 : index
    %c0_61 = arith.constant 0 : index
    %74 = vector.load %arg8[%c0_60, %c0_61] : memref<1x96xf32, #tpu.memory_space<vmem>>, vector<1x96xf32>
    %cst_62 = arith.constant 0.000000e+00 : f32
    %75 = vector.broadcast %cst_62 : f32 to vector<8x32xf32>
    %76 = vector.extract_strided_slice %72 {offsets = [0, 0], sizes = [8, 96], strides = [1, 1]} : vector<48x96xf32> to vector<8x96xf32>
    %cst_63 = arith.constant dense<0.000000e+00> : vector<8x96xf32>
    %77 = tpu.matmul %75, %73, %cst_63 {dimension_numbers = #tpu.dot_dimension_numbers<[1], [0], [0], [1], [0, 0, 1, 1], [], []>} : vector<8x32xf32>, vector<32x96xf32>, vector<8x96xf32> -> vector<8x96xf32>
    %78 = vector.broadcast %74 : vector<1x96xf32> to vector<8x96xf32>
    %79 = arith.addf %77, %78 : vector<8x96xf32>
    %80 = vector.extract_strided_slice %76 {offsets = [0, 0], sizes = [8, 32], strides = [1, 1]} : vector<8x96xf32> to vector<8x32xf32>
    %81 = vector.extract_strided_slice %79 {offsets = [0, 0], sizes = [8, 32], strides = [1, 1]} : vector<8x96xf32> to vector<8x32xf32>
    %82 = arith.addf %80, %81 : vector<8x32xf32>
    %83 = arith.negf %82 : vector<8x32xf32>
    %84 = math.exp %83 : vector<8x32xf32>
    %cst_64 = arith.constant 1.000000e+00 : f32
    %85 = vector.broadcast %cst_64 : f32 to vector<8x32xf32>
    %86 = arith.addf %85, %84 : vector<8x32xf32>
    %87 = arith.divf %85, %86 : vector<8x32xf32>
    %88 = vector.extract_strided_slice %76 {offsets = [0, 32], sizes = [8, 32], strides = [1, 1]} : vector<8x96xf32> to vector<8x32xf32>
    %89 = vector.extract_strided_slice %79 {offsets = [0, 32], sizes = [8, 32], strides = [1, 1]} : vector<8x96xf32> to vector<8x32xf32>
    %90 = arith.addf %88, %89 : vector<8x32xf32>
    %91 = arith.negf %90 : vector<8x32xf32>
    %92 = math.exp %91 : vector<8x32xf32>
    %cst_65 = arith.constant 1.000000e+00 : f32
    %93 = vector.broadcast %cst_65 : f32 to vector<8x32xf32>
    %94 = arith.addf %93, %92 : vector<8x32xf32>
    %95 = arith.divf %93, %94 : vector<8x32xf32>
    %96 = vector.extract_strided_slice %76 {offsets = [0, 64], sizes = [8, 32], strides = [1, 1]} : vector<8x96xf32> to vector<8x32xf32>
    %97 = vector.extract_strided_slice %79 {offsets = [0, 64], sizes = [8, 32], strides = [1, 1]} : vector<8x96xf32> to vector<8x32xf32>
    %98 = arith.mulf %87, %97 : vector<8x32xf32>
    %99 = arith.addf %96, %98 : vector<8x32xf32>
    %100 = math.tanh %99 : vector<8x32xf32>
    %cst_66 = arith.constant 1.000000e+00 : f32
    %101 = vector.broadcast %cst_66 : f32 to vector<8x32xf32>
    %102 = arith.subf %101, %95 : vector<8x32xf32>
    %103 = arith.mulf %102, %100 : vector<8x32xf32>
    %104 = arith.mulf %95, %75 : vector<8x32xf32>
    %105 = arith.addf %103, %104 : vector<8x32xf32>
    %106 = vector.extract_strided_slice %72 {offsets = [8, 0], sizes = [8, 96], strides = [1, 1]} : vector<48x96xf32> to vector<8x96xf32>
    %cst_67 = arith.constant dense<0.000000e+00> : vector<8x96xf32>
    %107 = tpu.matmul %105, %73, %cst_67 {dimension_numbers = #tpu.dot_dimension_numbers<[1], [0], [0], [1], [0, 0, 1, 1], [], []>} : vector<8x32xf32>, vector<32x96xf32>, vector<8x96xf32> -> vector<8x96xf32>
    %108 = vector.broadcast %74 : vector<1x96xf32> to vector<8x96xf32>
    %109 = arith.addf %107, %108 : vector<8x96xf32>
    %110 = vector.extract_strided_slice %106 {offsets = [0, 0], sizes = [8, 32], strides = [1, 1]} : vector<8x96xf32> to vector<8x32xf32>
    %111 = vector.extract_strided_slice %109 {offsets = [0, 0], sizes = [8, 32], strides = [1, 1]} : vector<8x96xf32> to vector<8x32xf32>
    %112 = arith.addf %110, %111 : vector<8x32xf32>
    %113 = arith.negf %112 : vector<8x32xf32>
    %114 = math.exp %113 : vector<8x32xf32>
    %cst_68 = arith.constant 1.000000e+00 : f32
    %115 = vector.broadcast %cst_68 : f32 to vector<8x32xf32>
    %116 = arith.addf %115, %114 : vector<8x32xf32>
    %117 = arith.divf %115, %116 : vector<8x32xf32>
    %118 = vector.extract_strided_slice %106 {offsets = [0, 32], sizes = [8, 32], strides = [1, 1]} : vector<8x96xf32> to vector<8x32xf32>
    %119 = vector.extract_strided_slice %109 {offsets = [0, 32], sizes = [8, 32], strides = [1, 1]} : vector<8x96xf32> to vector<8x32xf32>
    %120 = arith.addf %118, %119 : vector<8x32xf32>
    %121 = arith.negf %120 : vector<8x32xf32>
    %122 = math.exp %121 : vector<8x32xf32>
    %cst_69 = arith.constant 1.000000e+00 : f32
    %123 = vector.broadcast %cst_69 : f32 to vector<8x32xf32>
    %124 = arith.addf %123, %122 : vector<8x32xf32>
    %125 = arith.divf %123, %124 : vector<8x32xf32>
    %126 = vector.extract_strided_slice %106 {offsets = [0, 64], sizes = [8, 32], strides = [1, 1]} : vector<8x96xf32> to vector<8x32xf32>
    %127 = vector.extract_strided_slice %109 {offsets = [0, 64], sizes = [8, 32], strides = [1, 1]} : vector<8x96xf32> to vector<8x32xf32>
    %128 = arith.mulf %117, %127 : vector<8x32xf32>
    %129 = arith.addf %126, %128 : vector<8x32xf32>
    %130 = math.tanh %129 : vector<8x32xf32>
    %cst_70 = arith.constant 1.000000e+00 : f32
    %131 = vector.broadcast %cst_70 : f32 to vector<8x32xf32>
    %132 = arith.subf %131, %125 : vector<8x32xf32>
    %133 = arith.mulf %132, %130 : vector<8x32xf32>
    %134 = arith.mulf %125, %105 : vector<8x32xf32>
    %135 = arith.addf %133, %134 : vector<8x32xf32>
    %136 = vector.extract_strided_slice %72 {offsets = [16, 0], sizes = [8, 96], strides = [1, 1]} : vector<48x96xf32> to vector<8x96xf32>
    %cst_71 = arith.constant dense<0.000000e+00> : vector<8x96xf32>
    %137 = tpu.matmul %135, %73, %cst_71 {dimension_numbers = #tpu.dot_dimension_numbers<[1], [0], [0], [1], [0, 0, 1, 1], [], []>} : vector<8x32xf32>, vector<32x96xf32>, vector<8x96xf32> -> vector<8x96xf32>
    %138 = vector.broadcast %74 : vector<1x96xf32> to vector<8x96xf32>
    %139 = arith.addf %137, %138 : vector<8x96xf32>
    %140 = vector.extract_strided_slice %136 {offsets = [0, 0], sizes = [8, 32], strides = [1, 1]} : vector<8x96xf32> to vector<8x32xf32>
    %141 = vector.extract_strided_slice %139 {offsets = [0, 0], sizes = [8, 32], strides = [1, 1]} : vector<8x96xf32> to vector<8x32xf32>
    %142 = arith.addf %140, %141 : vector<8x32xf32>
    %143 = arith.negf %142 : vector<8x32xf32>
    %144 = math.exp %143 : vector<8x32xf32>
    %cst_72 = arith.constant 1.000000e+00 : f32
    %145 = vector.broadcast %cst_72 : f32 to vector<8x32xf32>
    %146 = arith.addf %145, %144 : vector<8x32xf32>
    %147 = arith.divf %145, %146 : vector<8x32xf32>
    %148 = vector.extract_strided_slice %136 {offsets = [0, 32], sizes = [8, 32], strides = [1, 1]} : vector<8x96xf32> to vector<8x32xf32>
    %149 = vector.extract_strided_slice %139 {offsets = [0, 32], sizes = [8, 32], strides = [1, 1]} : vector<8x96xf32> to vector<8x32xf32>
    %150 = arith.addf %148, %149 : vector<8x32xf32>
    %151 = arith.negf %150 : vector<8x32xf32>
    %152 = math.exp %151 : vector<8x32xf32>
    %cst_73 = arith.constant 1.000000e+00 : f32
    %153 = vector.broadcast %cst_73 : f32 to vector<8x32xf32>
    %154 = arith.addf %153, %152 : vector<8x32xf32>
    %155 = arith.divf %153, %154 : vector<8x32xf32>
    %156 = vector.extract_strided_slice %136 {offsets = [0, 64], sizes = [8, 32], strides = [1, 1]} : vector<8x96xf32> to vector<8x32xf32>
    %157 = vector.extract_strided_slice %139 {offsets = [0, 64], sizes = [8, 32], strides = [1, 1]} : vector<8x96xf32> to vector<8x32xf32>
    %158 = arith.mulf %147, %157 : vector<8x32xf32>
    %159 = arith.addf %156, %158 : vector<8x32xf32>
    %160 = math.tanh %159 : vector<8x32xf32>
    %cst_74 = arith.constant 1.000000e+00 : f32
    %161 = vector.broadcast %cst_74 : f32 to vector<8x32xf32>
    %162 = arith.subf %161, %155 : vector<8x32xf32>
    %163 = arith.mulf %162, %160 : vector<8x32xf32>
    %164 = arith.mulf %155, %135 : vector<8x32xf32>
    %165 = arith.addf %163, %164 : vector<8x32xf32>
    %166 = vector.extract_strided_slice %72 {offsets = [24, 0], sizes = [8, 96], strides = [1, 1]} : vector<48x96xf32> to vector<8x96xf32>
    %cst_75 = arith.constant dense<0.000000e+00> : vector<8x96xf32>
    %167 = tpu.matmul %165, %73, %cst_75 {dimension_numbers = #tpu.dot_dimension_numbers<[1], [0], [0], [1], [0, 0, 1, 1], [], []>} : vector<8x32xf32>, vector<32x96xf32>, vector<8x96xf32> -> vector<8x96xf32>
    %168 = vector.broadcast %74 : vector<1x96xf32> to vector<8x96xf32>
    %169 = arith.addf %167, %168 : vector<8x96xf32>
    %170 = vector.extract_strided_slice %166 {offsets = [0, 0], sizes = [8, 32], strides = [1, 1]} : vector<8x96xf32> to vector<8x32xf32>
    %171 = vector.extract_strided_slice %169 {offsets = [0, 0], sizes = [8, 32], strides = [1, 1]} : vector<8x96xf32> to vector<8x32xf32>
    %172 = arith.addf %170, %171 : vector<8x32xf32>
    %173 = arith.negf %172 : vector<8x32xf32>
    %174 = math.exp %173 : vector<8x32xf32>
    %cst_76 = arith.constant 1.000000e+00 : f32
    %175 = vector.broadcast %cst_76 : f32 to vector<8x32xf32>
    %176 = arith.addf %175, %174 : vector<8x32xf32>
    %177 = arith.divf %175, %176 : vector<8x32xf32>
    %178 = vector.extract_strided_slice %166 {offsets = [0, 32], sizes = [8, 32], strides = [1, 1]} : vector<8x96xf32> to vector<8x32xf32>
    %179 = vector.extract_strided_slice %169 {offsets = [0, 32], sizes = [8, 32], strides = [1, 1]} : vector<8x96xf32> to vector<8x32xf32>
    %180 = arith.addf %178, %179 : vector<8x32xf32>
    %181 = arith.negf %180 : vector<8x32xf32>
    %182 = math.exp %181 : vector<8x32xf32>
    %cst_77 = arith.constant 1.000000e+00 : f32
    %183 = vector.broadcast %cst_77 : f32 to vector<8x32xf32>
    %184 = arith.addf %183, %182 : vector<8x32xf32>
    %185 = arith.divf %183, %184 : vector<8x32xf32>
    %186 = vector.extract_strided_slice %166 {offsets = [0, 64], sizes = [8, 32], strides = [1, 1]} : vector<8x96xf32> to vector<8x32xf32>
    %187 = vector.extract_strided_slice %169 {offsets = [0, 64], sizes = [8, 32], strides = [1, 1]} : vector<8x96xf32> to vector<8x32xf32>
    %188 = arith.mulf %177, %187 : vector<8x32xf32>
    %189 = arith.addf %186, %188 : vector<8x32xf32>
    %190 = math.tanh %189 : vector<8x32xf32>
    %cst_78 = arith.constant 1.000000e+00 : f32
    %191 = vector.broadcast %cst_78 : f32 to vector<8x32xf32>
    %192 = arith.subf %191, %185 : vector<8x32xf32>
    %193 = arith.mulf %192, %190 : vector<8x32xf32>
    %194 = arith.mulf %185, %165 : vector<8x32xf32>
    %195 = arith.addf %193, %194 : vector<8x32xf32>
    %196 = vector.extract_strided_slice %72 {offsets = [32, 0], sizes = [8, 96], strides = [1, 1]} : vector<48x96xf32> to vector<8x96xf32>
    %cst_79 = arith.constant dense<0.000000e+00> : vector<8x96xf32>
    %197 = tpu.matmul %195, %73, %cst_79 {dimension_numbers = #tpu.dot_dimension_numbers<[1], [0], [0], [1], [0, 0, 1, 1], [], []>} : vector<8x32xf32>, vector<32x96xf32>, vector<8x96xf32> -> vector<8x96xf32>
    %198 = vector.broadcast %74 : vector<1x96xf32> to vector<8x96xf32>
    %199 = arith.addf %197, %198 : vector<8x96xf32>
    %200 = vector.extract_strided_slice %196 {offsets = [0, 0], sizes = [8, 32], strides = [1, 1]} : vector<8x96xf32> to vector<8x32xf32>
    %201 = vector.extract_strided_slice %199 {offsets = [0, 0], sizes = [8, 32], strides = [1, 1]} : vector<8x96xf32> to vector<8x32xf32>
    %202 = arith.addf %200, %201 : vector<8x32xf32>
    %203 = arith.negf %202 : vector<8x32xf32>
    %204 = math.exp %203 : vector<8x32xf32>
    %cst_80 = arith.constant 1.000000e+00 : f32
    %205 = vector.broadcast %cst_80 : f32 to vector<8x32xf32>
    %206 = arith.addf %205, %204 : vector<8x32xf32>
    %207 = arith.divf %205, %206 : vector<8x32xf32>
    %208 = vector.extract_strided_slice %196 {offsets = [0, 32], sizes = [8, 32], strides = [1, 1]} : vector<8x96xf32> to vector<8x32xf32>
    %209 = vector.extract_strided_slice %199 {offsets = [0, 32], sizes = [8, 32], strides = [1, 1]} : vector<8x96xf32> to vector<8x32xf32>
    %210 = arith.addf %208, %209 : vector<8x32xf32>
    %211 = arith.negf %210 : vector<8x32xf32>
    %212 = math.exp %211 : vector<8x32xf32>
    %cst_81 = arith.constant 1.000000e+00 : f32
    %213 = vector.broadcast %cst_81 : f32 to vector<8x32xf32>
    %214 = arith.addf %213, %212 : vector<8x32xf32>
    %215 = arith.divf %213, %214 : vector<8x32xf32>
    %216 = vector.extract_strided_slice %196 {offsets = [0, 64], sizes = [8, 32], strides = [1, 1]} : vector<8x96xf32> to vector<8x32xf32>
    %217 = vector.extract_strided_slice %199 {offsets = [0, 64], sizes = [8, 32], strides = [1, 1]} : vector<8x96xf32> to vector<8x32xf32>
    %218 = arith.mulf %207, %217 : vector<8x32xf32>
    %219 = arith.addf %216, %218 : vector<8x32xf32>
    %220 = math.tanh %219 : vector<8x32xf32>
    %cst_82 = arith.constant 1.000000e+00 : f32
    %221 = vector.broadcast %cst_82 : f32 to vector<8x32xf32>
    %222 = arith.subf %221, %215 : vector<8x32xf32>
    %223 = arith.mulf %222, %220 : vector<8x32xf32>
    %224 = arith.mulf %215, %195 : vector<8x32xf32>
    %225 = arith.addf %223, %224 : vector<8x32xf32>
    %226 = vector.extract_strided_slice %72 {offsets = [40, 0], sizes = [8, 96], strides = [1, 1]} : vector<48x96xf32> to vector<8x96xf32>
    %cst_83 = arith.constant dense<0.000000e+00> : vector<8x96xf32>
    %227 = tpu.matmul %225, %73, %cst_83 {dimension_numbers = #tpu.dot_dimension_numbers<[1], [0], [0], [1], [0, 0, 1, 1], [], []>} : vector<8x32xf32>, vector<32x96xf32>, vector<8x96xf32> -> vector<8x96xf32>
    %228 = vector.broadcast %74 : vector<1x96xf32> to vector<8x96xf32>
    %229 = arith.addf %227, %228 : vector<8x96xf32>
    %230 = vector.extract_strided_slice %226 {offsets = [0, 0], sizes = [8, 32], strides = [1, 1]} : vector<8x96xf32> to vector<8x32xf32>
    %231 = vector.extract_strided_slice %229 {offsets = [0, 0], sizes = [8, 32], strides = [1, 1]} : vector<8x96xf32> to vector<8x32xf32>
    %232 = arith.addf %230, %231 : vector<8x32xf32>
    %233 = arith.negf %232 : vector<8x32xf32>
    %234 = math.exp %233 : vector<8x32xf32>
    %cst_84 = arith.constant 1.000000e+00 : f32
    %235 = vector.broadcast %cst_84 : f32 to vector<8x32xf32>
    %236 = arith.addf %235, %234 : vector<8x32xf32>
    %237 = arith.divf %235, %236 : vector<8x32xf32>
    %238 = vector.extract_strided_slice %226 {offsets = [0, 32], sizes = [8, 32], strides = [1, 1]} : vector<8x96xf32> to vector<8x32xf32>
    %239 = vector.extract_strided_slice %229 {offsets = [0, 32], sizes = [8, 32], strides = [1, 1]} : vector<8x96xf32> to vector<8x32xf32>
    %240 = arith.addf %238, %239 : vector<8x32xf32>
    %241 = arith.negf %240 : vector<8x32xf32>
    %242 = math.exp %241 : vector<8x32xf32>
    %cst_85 = arith.constant 1.000000e+00 : f32
    %243 = vector.broadcast %cst_85 : f32 to vector<8x32xf32>
    %244 = arith.addf %243, %242 : vector<8x32xf32>
    %245 = arith.divf %243, %244 : vector<8x32xf32>
    %246 = vector.extract_strided_slice %226 {offsets = [0, 64], sizes = [8, 32], strides = [1, 1]} : vector<8x96xf32> to vector<8x32xf32>
    %247 = vector.extract_strided_slice %229 {offsets = [0, 64], sizes = [8, 32], strides = [1, 1]} : vector<8x96xf32> to vector<8x32xf32>
    %248 = arith.mulf %237, %247 : vector<8x32xf32>
    %249 = arith.addf %246, %248 : vector<8x32xf32>
    %250 = math.tanh %249 : vector<8x32xf32>
    %cst_86 = arith.constant 1.000000e+00 : f32
    %251 = vector.broadcast %cst_86 : f32 to vector<8x32xf32>
    %252 = arith.subf %251, %245 : vector<8x32xf32>
    %253 = arith.mulf %252, %250 : vector<8x32xf32>
    %254 = arith.mulf %245, %225 : vector<8x32xf32>
    %255 = arith.addf %253, %254 : vector<8x32xf32>
    %256 = arith.addf %66, %255 : vector<8x32xf32>
    %c0_87 = arith.constant 0 : index
    %c0_88 = arith.constant 0 : index
    %257 = vector.load %arg9[%c0_87, %c0_88] : memref<32x64xf32, #tpu.memory_space<vmem>>, vector<32x64xf32>
    %cst_89 = arith.constant dense<0.000000e+00> : vector<8x64xf32>
    %258 = tpu.matmul %256, %257, %cst_89 {dimension_numbers = #tpu.dot_dimension_numbers<[1], [0], [0], [1], [0, 0, 1, 1], [], []>} : vector<8x32xf32>, vector<32x64xf32>, vector<8x64xf32> -> vector<8x64xf32>
    %c0_90 = arith.constant 0 : index
    %c0_91 = arith.constant 0 : index
    %259 = vector.load %arg10[%c0_90, %c0_91] : memref<1x64xf32, #tpu.memory_space<vmem>>, vector<1x64xf32>
    %260 = vector.broadcast %259 : vector<1x64xf32> to vector<8x64xf32>
    %261 = arith.addf %258, %260 : vector<8x64xf32>
    %cst_92 = arith.constant dense<0.000000e+00> : vector<8xf32>
    %262 = vector.multi_reduction <add>, %261, %cst_92 [1] : vector<8x64xf32> to vector<8xf32>
    %263 = vector.shape_cast %262 : vector<8xf32> to vector<8x1xf32>
    %cst_93 = arith.constant 6.400000e+01 : f32
    %264 = vector.broadcast %cst_93 : f32 to vector<8x1xf32>
    %265 = arith.divf %263, %264 : vector<8x1xf32>
    %266 = vector.broadcast %265 : vector<8x1xf32> to vector<8x64xf32>
    %267 = arith.subf %261, %266 : vector<8x64xf32>
    %268 = arith.mulf %267, %267 : vector<8x64xf32>
    %cst_94 = arith.constant dense<0.000000e+00> : vector<8xf32>
    %269 = vector.multi_reduction <add>, %268, %cst_94 [1] : vector<8x64xf32> to vector<8xf32>
    %270 = vector.shape_cast %269 : vector<8xf32> to vector<8x1xf32>
    %cst_95 = arith.constant 6.400000e+01 : f32
    %271 = vector.broadcast %cst_95 : f32 to vector<8x1xf32>
    %272 = arith.divf %270, %271 : vector<8x1xf32>
    %273 = vector.broadcast %265 : vector<8x1xf32> to vector<8x64xf32>
    %274 = arith.subf %261, %273 : vector<8x64xf32>
    %cst_96 = arith.constant 9.99999974E-6 : f32
    %275 = vector.broadcast %cst_96 : f32 to vector<8x1xf32>
    %276 = arith.addf %272, %275 : vector<8x1xf32>
    %277 = math.rsqrt %276 : vector<8x1xf32>
    %278 = vector.broadcast %277 : vector<8x1xf32> to vector<8x64xf32>
    %279 = arith.mulf %274, %278 : vector<8x64xf32>
    %c0_97 = arith.constant 0 : index
    %c0_98 = arith.constant 0 : index
    %280 = vector.load %arg11[%c0_97, %c0_98] : memref<1x64xf32, #tpu.memory_space<vmem>>, vector<1x64xf32>
    %281 = vector.broadcast %280 : vector<1x64xf32> to vector<8x64xf32>
    %282 = arith.mulf %279, %281 : vector<8x64xf32>
    %c0_99 = arith.constant 0 : index
    %c0_100 = arith.constant 0 : index
    %283 = vector.load %arg12[%c0_99, %c0_100] : memref<1x64xf32, #tpu.memory_space<vmem>>, vector<1x64xf32>
    %284 = vector.broadcast %283 : vector<1x64xf32> to vector<8x64xf32>
    %285 = arith.addf %282, %284 : vector<8x64xf32>
    %cst_101 = arith.constant 0.000000e+00 : f32
    %286 = vector.broadcast %cst_101 : f32 to vector<8x64xf32>
    %287 = arith.maximumf %285, %286 : vector<8x64xf32>
    %c0_102 = arith.constant 0 : index
    %c0_103 = arith.constant 0 : index
    %288 = vector.load %arg13[%c0_102, %c0_103] : memref<64x32xf32, #tpu.memory_space<vmem>>, vector<64x32xf32>
    %cst_104 = arith.constant dense<0.000000e+00> : vector<8x32xf32>
    %289 = tpu.matmul %287, %288, %cst_104 {dimension_numbers = #tpu.dot_dimension_numbers<[1], [0], [0], [1], [0, 0, 1, 1], [], []>} : vector<8x64xf32>, vector<64x32xf32>, vector<8x32xf32> -> vector<8x32xf32>
    %c0_105 = arith.constant 0 : index
    %c0_106 = arith.constant 0 : index
    %290 = vector.load %arg14[%c0_105, %c0_106] : memref<1x32xf32, #tpu.memory_space<vmem>>, vector<1x32xf32>
    %291 = vector.broadcast %290 : vector<1x32xf32> to vector<8x32xf32>
    %292 = arith.addf %289, %291 : vector<8x32xf32>
    %c0_107 = arith.constant 0 : index
    %c0_108 = arith.constant 0 : index
    %293 = vector.load %arg15[%c0_107, %c0_108] : memref<8x32xf32, #tpu.memory_space<vmem>>, vector<8x32xf32>
    tpu.vector_store %arg15[%c0_107, %c0_108], %292 {strides = array<i32>} : memref<8x32xf32, #tpu.memory_space<vmem>>, vector<8x32xf32>,
    return
  }
  func.func @transform_0(%arg0: i32) -> (i32, i32, i32) {
    %c0_i32 = arith.constant 0 : i32
    %c0_i32_0 = arith.constant 0 : i32
    %c0_i32_1 = arith.constant 0 : i32
    %c0_i32_2 = arith.constant 0 : i32
    return %c0_i32, %c0_i32_0, %c0_i32_1 : i32, i32, i32
  }
  func.func @transform_1(%arg0: i32) -> (i32, i32, i32) {
    %c0_i32 = arith.constant 0 : i32
    %c0_i32_0 = arith.constant 0 : i32
    %c0_i32_1 = arith.constant 0 : i32
    %c0_i32_2 = arith.constant 0 : i32
    return %c0_i32, %c0_i32_0, %c0_i32_1 : i32, i32, i32
  }
  func.func @transform_2(%arg0: i32) -> (i32, i32, i32) {
    %c0_i32 = arith.constant 0 : i32
    %c0_i32_0 = arith.constant 0 : i32
    %c0_i32_1 = arith.constant 0 : i32
    %c0_i32_2 = arith.constant 0 : i32
    return %c0_i32, %c0_i32_0, %c0_i32_1 : i32, i32, i32
  }
  func.func @transform_3(%arg0: i32) -> (i32, i32) {
    %c0_i32 = arith.constant 0 : i32
    %c0_i32_0 = arith.constant 0 : i32
    %c0_i32_1 = arith.constant 0 : i32
    return %c0_i32, %c0_i32_0 : i32, i32
  }
  func.func @transform_4(%arg0: i32) -> (i32, i32) {
    %c0_i32 = arith.constant 0 : i32
    %c0_i32_0 = arith.constant 0 : i32
    %c0_i32_1 = arith.constant 0 : i32
    return %c0_i32, %c0_i32_0 : i32, i32
  }
  func.func @transform_5(%arg0: i32) -> (i32, i32) {
    %c0_i32 = arith.constant 0 : i32
    %c0_i32_0 = arith.constant 0 : i32
    %c0_i32_1 = arith.constant 0 : i32
    return %c0_i32, %c0_i32_0 : i32, i32
  }
  func.func @transform_6(%arg0: i32) -> (i32, i32) {
    %c0_i32 = arith.constant 0 : i32
    %c0_i32_0 = arith.constant 0 : i32
    %c0_i32_1 = arith.constant 0 : i32
    return %c0_i32, %c0_i32_0 : i32, i32
  }
  func.func @transform_7(%arg0: i32) -> (i32, i32) {
    %c0_i32 = arith.constant 0 : i32
    %c0_i32_0 = arith.constant 0 : i32
    %c0_i32_1 = arith.constant 0 : i32
    return %c0_i32, %c0_i32_0 : i32, i32
  }
  func.func @transform_8(%arg0: i32) -> (i32, i32) {
    %c0_i32 = arith.constant 0 : i32
    %c0_i32_0 = arith.constant 0 : i32
    %c0_i32_1 = arith.constant 0 : i32
    return %c0_i32, %c0_i32_0 : i32, i32
  }
  func.func @transform_9(%arg0: i32) -> (i32, i32) {
    %c0_i32 = arith.constant 0 : i32
    %c0_i32_0 = arith.constant 0 : i32
    %c0_i32_1 = arith.constant 0 : i32
    return %c0_i32, %c0_i32_0 : i32, i32
  }
  func.func @transform_10(%arg0: i32) -> (i32, i32) {
    %c0_i32 = arith.constant 0 : i32
    %c0_i32_0 = arith.constant 0 : i32
    %c0_i32_1 = arith.constant 0 : i32
    return %c0_i32, %c0_i32_0 : i32, i32
  }
  func.func @transform_11(%arg0: i32) -> (i32, i32) {
    %c0_i32 = arith.constant 0 : i32
    %c0_i32_0 = arith.constant 0 : i32
    %c0_i32_1 = arith.constant 0 : i32
    return %c0_i32, %c0_i32_0 : i32, i32
  }
  func.func @transform_12(%arg0: i32) -> (i32, i32) {
    %c0_i32 = arith.constant 0 : i32
    %c0_i32_0 = arith.constant 0 : i32
    %c0_i32_1 = arith.constant 0 : i32
    return %c0_i32, %c0_i32_0 : i32, i32
  }
  func.func @transform_13(%arg0: i32) -> (i32, i32) {
    %c0_i32 = arith.constant 0 : i32
    %c0_i32_0 = arith.constant 0 : i32
    %c0_i32_1 = arith.constant 0 : i32
    return %c0_i32, %c0_i32_0 : i32, i32
  }
  func.func @transform_14(%arg0: i32) -> (i32, i32) {
    %c0_i32 = arith.constant 0 : i32
    %c0_i32_0 = arith.constant 0 : i32
    %c0_i32_1 = arith.constant 0 : i32
    return %c0_i32, %c0_i32_0 : i32, i32
  }
}

</mosaic_0001>

<bundles_post_ra>
// kernel: tpu_custom_call.1
= control target key start
LH: loop header
LB: loop body
LE: loop exit
PB: predicated region body
PF: predicated region fallthrough
CT: control target
= control target key end

     0   :  { %vm62_vm0 = vcmask 261120   ;;  %s1438_s0 = inlined_call_operand.vmem [shape: f32[5,8,32], index: 0, kind: input, shape index: {}]   ;;  %s1439_s1 = inlined_call_operand.vmem [shape: f32[8,64,32], index: 1, kind: input, shape index: {}]   ;;  %s1440_s2 = inlined_call_operand.vmem [shape: f32[8,1,32], index: 2, kind: input, shape index: {}]   ;;  %s1441_s3 = inlined_call_operand.vmem [shape: f32[48,32], index: 3, kind: input, shape index: {}]   ;;  %s1442_s4 = inlined_call_operand.vmem [shape: f32[32,96], index: 4, kind: input, shape index: {}]   ;;  %s1443_s5 = inlined_call_operand.vmem [shape: f32[32,96], index: 5, kind: input, shape index: {}]   ;;  %s1444_s6 = inlined_call_operand.vmem [shape: f32[1,96], index: 6, kind: input, shape index: {}]   ;;  %s1445_s7 = inlined_call_operand.vmem [shape: f32[1,96], index: 7, kind: input, shape index: {}]   ;;  %s1446_s8 = inlined_call_operand.vmem [shape: f32[32,64], index: 8, kind: input, shape index: {}]   ;;  %s1447_s9 = inlined_call_operand.vmem [shape: f32[1,64], index: 9, kind: input, shape index: {}]   ;;  %s1448_s10 = inlined_call_operand.vmem [shape: f32[1,64], index: 10, kind: input, shape index: {}]   ;;  %s1449_s11 = inlined_call_operand.vmem [shape: f32[1,64], index: 11, kind: input, shape index: {}]   ;;  %s1450_s12 = inlined_call_operand.vmem [shape: f32[64,32], index: 12, kind: input, shape index: {}]   ;;  %s1451_s13 = inlined_call_operand.vmem [shape: f32[1,32], index: 13, kind: input, shape index: {}]   ;;  %s1452_s14 = inlined_call_operand.hbm [shape: f32[8,32], index: 14, kind: output, shape index: {}]  }
   0x1   :  { %v890_v0 = vld [vmem:[%s1439_s1 + $0x78] sm:$0xff]  ;;  %v889_v4 = vld [vmem:[%s1439_s1 + $0x70] sm:$0xff]  ;;  %v888_v8 = vld [vmem:[%s1439_s1 + $0x68] sm:$0xff] }
   0x2   :  { %v886_v1 = vld [vmem:[%s1439_s1 + $0x58] sm:$0xff]  ;;  %78 = vmatpush.msra.mxu0 %v890_v0  ;;  %v885_v5 = vld [vmem:[%s1439_s1 + $0x50] sm:$0xff]  ;;  %v884_v9 = vld [vmem:[%s1439_s1 + $0x48] sm:$0xff] }
   0x3   :  { %v903_v2 = vld [vmem:[%s1439_s1 + $0xf8] sm:$0xff]  ;;  %101 = vmatpush.msra.mxu1 %v886_v1  ;;  %v902_v6 = vld [vmem:[%s1439_s1 + $0xf0] sm:$0xff]  ;;  %v901_v10 = vld [vmem:[%s1439_s1 + $0xe8] sm:$0xff] }
   0x4   :  { %v899_v3 = vld [vmem:[%s1439_s1 + $0xd8] sm:$0xff]  ;;  %144 = vmatpush.msra.mxu2 %v903_v2  ;;  %v898_v7 = vld [vmem:[%s1439_s1 + $0xd0] sm:$0xff]  ;;  %79 = vmatpush.msra.mxu0 %v889_v4  ;;  %v897_v11 = vld [vmem:[%s1439_s1 + $0xc8] sm:$0xff] }
   0x5   :  { %167 = vmatpush.msra.mxu3 %v899_v3  ;;  %102 = vmatpush.msra.mxu1 %v885_v5  ;;  %v887_v12 = vld [vmem:[%s1439_s1 + $0x60] sm:$0xff]  ;;  %v882_v16 = vld [vmem:[%s1438_s0 + $0x10] sm:$0xff]  ;;  %v894_v19 = vld [vmem:[%s1438_s0 + $0x8] sm:$0xff] }
   0x6   :  { %145 = vmatpush.msra.mxu2 %v902_v6  ;;  %v883_v13 = vld [vmem:[%s1439_s1 + $0x40] sm:$0xff]  ;;  %80 = vmatpush.msra.mxu0 %v888_v8  ;;  %v185_v20 = vld [vmem:[%s1439_s1 + $0x18] sm:$0xff]  ;;  %v184_v24 = vld [vmem:[%s1439_s1 + $0x10] sm:$0xff] }
   0x7   :  { %168 = vmatpush.msra.mxu3 %v898_v7  ;;  %103 = vmatpush.msra.mxu1 %v884_v9  ;;  %v900_v14 = vld [vmem:[%s1439_s1 + $0xe0] sm:$0xff]  ;;  %v189_v21 = vld [vmem:[%s1439_s1 + $0x38] sm:$0xff]  ;;  %v188_v25 = vld [vmem:[%s1439_s1 + $0x30] sm:$0xff] }
   0x8   :  { %v896_v15 = vld [vmem:[%s1439_s1 + $0xc0] sm:$0xff]  ;;  %146 = vmatpush.msra.mxu2 %v901_v10  ;;  %81 = vmatpush.msra.mxu0 %v887_v12  ;;  %v917_v22 = vld [vmem:[%s1439_s1 + $0x1f8] sm:$0xff]  ;;  %v916_v26 = vld [vmem:[%s1439_s1 + $0x1f0] sm:$0xff] }
   0x9   :  { %169 = vmatpush.msra.mxu3 %v897_v11  ;;  %v48_v17 = vld [vmem:[%s1438_s0] sm:$0xff]  ;;  %104 = vmatpush.msra.mxu1 %v883_v13  ;;  %v913_v23 = vld [vmem:[%s1439_s1 + $0x1d8] sm:$0xff]  ;;  %v912_v27 = vld [vmem:[%s1439_s1 + $0x1d0] sm:$0xff] }
   0xa   :  { %v895_v18 = vld [vmem:[%s1438_s0 + $0x20] sm:$0xff]  ;;  %147 = vmatpush.msra.mxu2 %v900_v14  ;;  %892 = vmatmul.msk.f32.vlgmr.msra.gmra.mxu0 %vm62_vm0, %v882_v16  ;;  %v183_v28 = vld [vmem:[%s1439_s1 + $0x8] sm:$0xff]  ;;  %v907_v36 = vld [vmem:[%s1438_s0 + $0x18] sm:$0xff] }
   0xb   :  { %170 = vmatpush.msra.mxu3 %v896_v15  ;;  %893 = vmatmul.msk.f32.vlgmr.msra.gmra.mxu1 %vm62_vm0, %v48_v17  ;;  %v187_v29 = vld [vmem:[%s1439_s1 + $0x28] sm:$0xff]  ;;  %v182_v32 = vld [vmem:[%s1439_s1] sm:$0xff]  ;;  %v1223_v37 = vld [vmem:[%s1443_s5 + $0x18] sm:$0xff] }
   0xc   :  { %905 = vmatmul.msk.f32.vlgmr.msra.gmra.mxu2 %vm62_vm0, %v895_v18  ;;  %906 = vmatmul.msk.f32.vlgmr.msra.gmra.mxu3 %vm62_vm0, %v894_v19  ;;  %v915_v30 = vld [vmem:[%s1439_s1 + $0x1e8] sm:$0xff]  ;;  %v186_v33 = vld [vmem:[%s1439_s1 + $0x20] sm:$0xff]  ;;  %v305_v38 = vld [vmem:[%s1442_s4 + $0x18] sm:$0xff] }
   0xd   :  { %226 = vmatpush.msrb.mxu1 %v185_v20  ;;  %206 = vmatpush.msrb.mxu0 %v189_v21  ;;  %v911_v31 = vld [vmem:[%s1439_s1 + $0x1c8] sm:$0xff]  ;;  %v914_v34 = vld [vmem:[%s1439_s1 + $0x1e0] sm:$0xff] }
   0xe   :  { %262 = vmatpush.msrb.mxu2 %v917_v22  ;;  %282 = vmatpush.msrb.mxu3 %v913_v23  ;;  %v910_v35 = vld [vmem:[%s1439_s1 + $0x1c0] sm:$0xff] }
   0xf   :  { %227 = vmatpush.msrb.mxu1 %v184_v24  ;;  %207 = vmatpush.msrb.mxu0 %v188_v25 }
  0x10   :  { %263 = vmatpush.msrb.mxu2 %v916_v26  ;;  %283 = vmatpush.msrb.mxu3 %v912_v27 }
  0x11   :  { %228 = vmatpush.msrb.mxu1 %v183_v28  ;;  %208 = vmatpush.msrb.mxu0 %v187_v29 }
  0x12   :  { %264 = vmatpush.msrb.mxu2 %v915_v30  ;;  %284 = vmatpush.msrb.mxu3 %v911_v31 }
  0x13   :  { %229 = vmatpush.msrb.mxu1 %v182_v32  ;;  %209 = vmatpush.msrb.mxu0 %v186_v33 }
  0x14   :  { %265 = vmatpush.msrb.mxu2 %v914_v34  ;;  %285 = vmatpush.msrb.mxu3 %v910_v35 }
  0x15   :  { %19 = vsyncpa [#allocation3], 0  ;;  %908 = vmatmul.msk.f32.vlgmr.msrb.gmra.mxu0 %vm62_vm0, %v907_v36  ;;  %909 = vmatmul.msk.f32.vlgmr.msrb.gmra.mxu1 %vm62_vm0, %v882_v16  ;;  %v1235_v39 = vld [vmem:[%s1443_s5 + $0x10] sm:$0xff]  ;;  %v1244_v41 = vld [vmem:[%s1443_s5 + $0x8] sm:$0xff]  ;;  %v1025_v46 = vmov 0.0   ;;  %s1026_s27 = smov 64  }
  0x16   :  { %919 = vmatmul.msk.f32.vlgmr.msrb.gmra.mxu2 %vm62_vm0, %v48_v17  ;;  %920 = vmatmul.msk.f32.vlgmr.msrb.gmra.mxu3 %vm62_vm0, %v895_v18  ;;  %v304_v40 = vld [vmem:[%s1442_s4 + $0x10] sm:$0xff]  ;;  %v303_v42 = vld [vmem:[%s1442_s4 + $0x8] sm:$0xff]  ;;  %v1254_v43 = vld [vmem:[%s1443_s5] sm:$0xff]  ;;  %s1029_s0 = smov [#allocation2]   ;;  %s873_s28 = sshll.u32 %s1452_s14, 4  ;;  %s874_s28 = int_to_ptr.hbm [resolvable:$true] %s873_s28 }
  0x17   :  { %386 = vmatpush.msra.mxu1 %v1223_v37  ;;  %340 = vmatpush.msra.mxu0 %v305_v38  ;;  %v302_v44 = vld [vmem:[%s1442_s4] sm:$0xff]  ;;  %v297_v30 = vld [vmem:[%s1441_s3 + $0x8] sm:$0xff]  ;;  %s871_s1 = sshll.u32 %s1029_s0, 4  ;;  %s872_s1 = int_to_ptr.vmem [resolvable:$true] %s871_s1 }
  0x18   :  { %450 = vmatpush.msra.mxu2 %v1223_v37  ;;  %940 = vmatpush.msra.mxu3 %v305_v38  ;;  %v296_v45 = vld [vmem:[%s1441_s3] sm:$0xff] }
  0x19   :  { %387 = vmatpush.msra.mxu1 %v1235_v39  ;;  %341 = vmatpush.msra.mxu0 %v304_v40  ;;  %v949_v50 = vld [vmem:[%s1440_s2 + $0x1] ss:$0 sm:$0xff]  ;;  %v950_v51 = vld [vmem:[%s1440_s2 + $0x3] ss:$0 sm:$0xff]  ;;  %v951_v55 = vld [vmem:[%s1440_s2] ss:$0 sm:$0xff] }
  0x1a   :  { %451 = vmatpush.msra.mxu2 %v1235_v39  ;;  %941 = vmatpush.msra.mxu3 %v304_v40  ;;  %v1294_v0 = vld [vmem:[%s1445_s7] ss:$0 sm:$0xff] }
  0x1b   :  { %388 = vmatpush.msra.mxu1 %v1244_v41  ;;  %342 = vmatpush.msra.mxu0 %v303_v42  ;;  %v1301_v3 = vld [vmem:[%s1444_s6] ss:$0 sm:$0xff]  ;;  %s1027_s6 = smov 96  }
  0x1c   :  { %452 = vmatpush.msra.mxu2 %v1244_v41  ;;  %942 = vmatpush.msra.mxu3 %v303_v42 }
  0x1d   :  { %389 = vmatpush.msra.mxu1 %v1254_v43  ;;  %343 = vmatpush.msra.mxu0 %v302_v44 }
  0x1e   :  { %921 = vmatmul.msk.f32.vlgmr.msra.gmra.mxu0 %vm62_vm0, %v296_v45  ;;  %390 = vmatmul.f32.vlgmr.msra.gmra.mxu1 %v1025_v46 }
  0x1f   :  { %453 = vmatpush.msra.mxu2 %v1254_v43  ;;  %943 = vmatpush.msra.mxu3 %v302_v44 }
  0x20   :  { %578 = vmatpush.msrb.mxu1 %v1223_v37 }
  0x21   :  { %514 = vmatpush.msrb.mxu3 %v1223_v37  ;;  %642 = vmatpush.msrb.mxu2 %v1223_v37 }
  0x22   :  { %579 = vmatpush.msrb.mxu1 %v1235_v39 }
  0x23   :  { %515 = vmatpush.msrb.mxu3 %v1235_v39  ;;  %643 = vmatpush.msrb.mxu2 %v1235_v39 }
  0x24   :  { %580 = vmatpush.msrb.mxu1 %v1244_v41 }
  0x25   :  { %516 = vmatpush.msrb.mxu3 %v1244_v41  ;;  %644 = vmatpush.msrb.mxu2 %v1244_v41 }
  0x26   :  { %581 = vmatpush.msrb.mxu1 %v1254_v43  ;;  %922 = vmatmul.msk.f32.gmra.mxu0 %vm62_vm0, %v297_v30 }
  0x27   :  { %517 = vmatpush.msrb.mxu3 %v1254_v43  ;;  %645 = vmatpush.msrb.mxu2 %v1254_v43 }
  0x87   :  { %v83_v47 = vpop.f32.mrf.mxu0 }
  0x88   :  { %v106_v48 = vpop.f32.mrf.mxu1 }
  0x89   :  { %v107_v49 = vadd.f32 %v106_v48, %v83_v47 }
  0x8b   :  { %v112_v56 = vadd.f32 %v949_v50, %v107_v49 }
  0x8f   :  { %v149_v52 = vpop.f32.mrf.mxu2  ;;  %v172_v53 = vpop.f32.mrf.mxu3 }
  0x90   :  { %v173_v54 = vadd.f32 %v172_v53, %v149_v52 }
  0x92   :  { %v178_v57 = vadd.f32 %v950_v51, %v173_v54  ;;  %v211_v58 = vpop.f32.mrf.mxu0  ;;  %v231_v59 = vpop.f32.mrf.mxu1 }
  0x93   :  { %v232_v60 = vadd.f32 %v231_v59, %v211_v58 }
  0x94   :  { %v179_v61 = vadd.f32 %v178_v57, %v112_v56 }
  0x95   :  { %v237_v62 = vadd.f32 %v951_v55, %v232_v60  ;;  %v300_v60 = vld [vmem:[%s1441_s3 + $0x20] sm:$0xff] }
  0x96   :  { %925 = vmatmul.msk.f32.vlgmr.msra.gmra.mxu3 %vm62_vm0, %v300_v60 }
  0x97   :  { %v1289_v63 = vadd.f32 %v237_v62, %v179_v61  ;;  %706 = vmatpush.msra.mxu3 %v1223_v37  ;;  %v301_v61 = vld [vmem:[%s1441_s3 + $0x28] sm:$0xff]  ;;  %v298_v37 = vld [vmem:[%s1441_s3 + $0x10] sm:$0xff] }
  0x98   :  { %923 = vmatmul.msk.f32.gmra.mxu0 %vm62_vm0, %v298_v37 }
  0x99   :  { %v1312_v32 = vpop.f32.mrf.mxu2  ;;  %707 = vmatpush.msra.mxu3 %v1235_v39 }
  0x9b   :  { %v391_v1 = vpop.f32.mrf.mxu1  ;;  %v345_v4 = vpop.f32.mrf.mxu0  ;;  %708 = vmatpush.msra.mxu3 %v1244_v41 }
  0x9c   :  { %v392_v2 = vadd.f32 %v1294_v0, %v391_v1  ;;  %v346_v5 = vadd.f32 %v1301_v3, %v345_v4  ;;  %v1337_v41 = vpop.f32.mrf.mxu3 }
  0x9d   :  { %709 = vmatpush.msra.mxu3 %v1254_v43 }
  0x9e   :  { %415 = vrot.lane.b32.xlu0 %v392_v2, %s1026_s27  ;;  %v394_v6 = vadd.f32 %v392_v2, %v346_v5  ;;  %926 = vmatmul.msk.f32.gmra.mxu3 %vm62_vm0, %v301_v61 }
  0xa0   :  { %v927_v7 = vmul.f32 -1.442695, %v394_v6 }
  0xa2   :  { %959 = vpow2.f32 %v927_v7 }
  0xa3   :  { %v348_v35 = vpop.f32.mrf.mxu0 }
  0xa4   :  { %v349_v36 = vadd.f32 %v1301_v3, %v348_v35 }
  0xa8   :  { %v960_v8 = vpop.eup %959 }
  0xa9   :  { %v398_v9 = vadd.f32 1.0, %v960_v8 }
  0xab   :  { %961 = vrcp.f32 %v398_v9  ;;  %v410_v15 = vand.u32 2147483648, %v398_v9  ;;  %vm404_vm2 = vweird.f32 %v398_v9  ;;  %v408_v16 = vand.u32 2147483647, %v398_v9 }
  0xad   :  { %v411_v18 = vor.u32 1.1754944e-38, %v410_v15  ;;  %vm409_vm4 = vcmp.eq.f32.partialorder %v408_v16, 8.507059e+37 }
  0xb1   :  { %v962_v10 = vpop.eup %961 }
  0xb2   :  { %v400_v11 = vmul.f32 %v962_v10, %v398_v9  ;;  %vm405_vm1 = vweird.f32 %v962_v10 }
  0xb3   :  { %vm406_vm3 = vmor %vm404_vm2, %vm405_vm1 }
  0xb4   :  { %v401_v12 = vsub.f32 1.0, %v400_v11 }
  0xb6   :  { %v402_v13 = vmul.f32 %v962_v10, %v401_v12 }
  0xb8   :  { %v403_v14 = vadd.f32 %v962_v10, %v402_v13 }
  0xba   :  { %v407_v17 = vsel %vm406_vm3, %v962_v10, %v403_v14 }
  0xbb   :  { %v412_v20 = vsel %vm409_vm4, %v411_v18, %v407_v17 }
  0xbc   :  { %v425_v25 = vsub.f32 1.0, %v412_v20  ;;  %v431_v27 = vmul.f32 0.0, %v412_v20 }
 0x110   :  { %v416_v19 = vpop.permute.xlu0 %415 }
 0x111   :  { %v418_v21 = vmul.f32 %v416_v19, %v412_v20 }
 0x113   :  { %420 = vrot.lane.b32.xlu0 %v418_v21, %s1026_s27 }
 0x115   :  { %v351_v9 = vpop.f32.mrf.mxu0 }
 0x116   :  { %v352_v10 = vadd.f32 %v1301_v3, %v351_v9 }
 0x119   :  { %v1339_v43 = vpop.f32.mrf.mxu3 }
 0x121   :  { %v1341_v6 = vpop.f32.mrf.mxu3 }
 0x185   :  { %v421_v22 = vpop.permute.xlu0 %420 }
 0x186   :  { %v423_v23 = vadd.f32 %v421_v22, %v346_v5 }
 0x188   :  { %963 = vtanh.f32 %v423_v23 }
 0x18e   :  { %v964_v24 = vpop.eup %963 }
 0x18f   :  { %427 = vrot.lane.b32.xlu1 %v964_v24, %s1027_s6 }
 0x201   :  { %v428_v26 = vpop.permute.xlu1 %427 }
 0x202   :  { %v430_v28 = vmul.f32 %v428_v26, %v425_v25 }
 0x204   :  { %v432_v29 = vadd.f32 %v431_v27, %v430_v28 }
 0x206   :  { %434 = vrot.lane.b32.xlu1 %v432_v29, %s1027_s6 }
 0x278   :  { %v435_v31 = vpop.permute.xlu1 %434 }
 0x279   :  { %928 = vmatmul.msk.f32.vlgmr.msra.gmra.mxu2 %vm62_vm0, %v435_v31 }
 0x2fc   :  { %v455_v33 = vpop.f32.mrf.mxu2 }
 0x2fd   :  { %v456_v34 = vadd.f32 %v1294_v0, %v455_v33 }
 0x2ff   :  { %479 = vrot.lane.b32.xlu2 %v456_v34, %s1026_s27  ;;  %v458_v38 = vadd.f32 %v456_v34, %v349_v36 }
 0x301   :  { %v929_v40 = vmul.f32 -1.442695, %v458_v38 }
 0x303   :  { %965 = vpow2.f32 %v929_v40 }
 0x309   :  { %v966_v42 = vpop.eup %965 }
 0x30a   :  { %v462_v44 = vadd.f32 1.0, %v966_v42 }
 0x30c   :  { %967 = vrcp.f32 %v462_v44  ;;  %v474_v50 = vand.u32 2147483648, %v462_v44  ;;  %vm468_vm6 = vweird.f32 %v462_v44  ;;  %v472_v51 = vand.u32 2147483647, %v462_v44 }
 0x30e   :  { %v475_v53 = vor.u32 1.1754944e-38, %v474_v50  ;;  %vm473_vm8 = vcmp.eq.f32.partialorder %v472_v51, 8.507059e+37 }
 0x312   :  { %v968_v45 = vpop.eup %967 }
 0x313   :  { %v464_v46 = vmul.f32 %v968_v45, %v462_v44  ;;  %vm469_vm5 = vweird.f32 %v968_v45 }
 0x314   :  { %vm470_vm7 = vmor %vm468_vm6, %vm469_vm5 }
 0x315   :  { %v465_v47 = vsub.f32 1.0, %v464_v46 }
 0x317   :  { %v466_v48 = vmul.f32 %v968_v45, %v465_v47 }
 0x319   :  { %v467_v49 = vadd.f32 %v968_v45, %v466_v48 }
 0x31b   :  { %v471_v52 = vsel %vm470_vm7, %v968_v45, %v467_v49 }
 0x31c   :  { %v476_v55 = vsel %vm473_vm8, %v475_v53, %v471_v52 }
 0x31d   :  { %v489_v62 = vsub.f32 1.0, %v476_v55  ;;  %v495_v2 = vmul.f32 %v476_v55, %v432_v29 }
 0x359   :  { %v480_v54 = vpop.permute.xlu2 %479 }
 0x35a   :  { %v482_v56 = vmul.f32 %v480_v54, %v476_v55 }
 0x35c   :  { %484 = vrot.lane.b32.xlu2 %v482_v56, %s1026_s27 }
 0x3b6   :  { %v485_v57 = vpop.permute.xlu2 %484 }
 0x3b7   :  { %v487_v58 = vadd.f32 %v485_v57, %v349_v36  ;;  %v299_v36 = vld [vmem:[%s1441_s3 + $0x18] sm:$0xff] }
 0x3b8   :  { %924 = vmatmul.msk.f32.gmra.mxu0 %vm62_vm0, %v299_v36 }
 0x3b9   :  { %969 = vtanh.f32 %v487_v58 }
 0x3bf   :  { %v970_v59 = vpop.eup %969 }
 0x3c0   :  { %491 = vrot.lane.b32.xlu0 %v970_v59, %s1027_s6 }
 0x432   :  { %v492_v1 = vpop.permute.xlu0 %491 }
 0x433   :  { %v494_v4 = vmul.f32 %v492_v1, %v489_v62 }
 0x435   :  { %v496_v5 = vadd.f32 %v495_v2, %v494_v4  ;;  %v354_v44 = vpop.f32.mrf.mxu0 }
 0x436   :  { %v355_v45 = vadd.f32 %v1301_v3, %v354_v44 }
 0x437   :  { %498 = vrot.lane.b32.xlu1 %v496_v5, %s1027_s6 }
 0x4a9   :  { %v499_v39 = vpop.permute.xlu1 %498 }
 0x4aa   :  { %930 = vmatmul.msk.f32.vlgmr.msrb.gmra.mxu3 %vm62_vm0, %v499_v39 }
 0x52d   :  { %v519_v7 = vpop.f32.mrf.mxu3 }
 0x52e   :  { %v520_v8 = vadd.f32 %v1294_v0, %v519_v7 }
 0x530   :  { %543 = vrot.lane.b32.xlu2 %v520_v8, %s1026_s27  ;;  %v522_v11 = vadd.f32 %v520_v8, %v352_v10 }
 0x532   :  { %v931_v12 = vmul.f32 -1.442695, %v522_v11  ;;  %v358_v11 = vadd.f32 %v1301_v3, %v1339_v43 }
 0x534   :  { %971 = vpow2.f32 %v931_v12 }
 0x53a   :  { %v972_v13 = vpop.eup %971 }
 0x53b   :  { %v526_v14 = vadd.f32 1.0, %v972_v13 }
 0x53d   :  { %973 = vrcp.f32 %v526_v14  ;;  %v538_v20 = vand.u32 2147483648, %v526_v14  ;;  %vm532_vm10 = vweird.f32 %v526_v14  ;;  %v536_v21 = vand.u32 2147483647, %v526_v14 }
 0x53f   :  { %v539_v23 = vor.u32 1.1754944e-38, %v538_v20  ;;  %vm537_vm12 = vcmp.eq.f32.partialorder %v536_v21, 8.507059e+37 }
 0x543   :  { %v974_v15 = vpop.eup %973 }
 0x544   :  { %v528_v16 = vmul.f32 %v974_v15, %v526_v14  ;;  %vm533_vm9 = vweird.f32 %v974_v15 }
 0x545   :  { %vm534_vm11 = vmor %vm532_vm10, %vm533_vm9  ;;  %vm789_vm10 = vcmask 523264  }
 0x546   :  { %v529_v17 = vsub.f32 1.0, %v528_v16 }
 0x548   :  { %v530_v18 = vmul.f32 %v974_v15, %v529_v17 }
 0x54a   :  { %v531_v19 = vadd.f32 %v974_v15, %v530_v18 }
 0x54c   :  { %v535_v22 = vsel %vm534_vm11, %v974_v15, %v531_v19 }
 0x54d   :  { %v540_v25 = vsel %vm537_vm12, %v539_v23, %v535_v22 }
 0x54e   :  { %v553_v30 = vsub.f32 1.0, %v540_v25  ;;  %v559_v33 = vmul.f32 %v540_v25, %v496_v5 }
 0x58a   :  { %v544_v24 = vpop.permute.xlu2 %543 }
 0x58b   :  { %v546_v26 = vmul.f32 %v544_v24, %v540_v25 }
 0x58d   :  { %548 = vrot.lane.b32.xlu0 %v546_v26, %s1026_s27 }
 0x5ff   :  { %v549_v27 = vpop.permute.xlu0 %548 }
 0x600   :  { %v551_v28 = vadd.f32 %v549_v27, %v352_v10 }
 0x602   :  { %975 = vtanh.f32 %v551_v28 }
 0x608   :  { %v976_v29 = vpop.eup %975 }
 0x609   :  { %555 = vrot.lane.b32.xlu1 %v976_v29, %s1027_s6 }
 0x67b   :  { %v556_v31 = vpop.permute.xlu1 %555 }
 0x67c   :  { %v558_v34 = vmul.f32 %v556_v31, %v553_v30 }
 0x67e   :  { %v560_v35 = vadd.f32 %v559_v33, %v558_v34 }
 0x680   :  { %562 = vrot.lane.b32.xlu2 %v560_v35, %s1027_s6 }
 0x6da   :  { %v563_v38 = vpop.permute.xlu2 %562 }
 0x6db   :  { %932 = vmatmul.msk.f32.vlgmr.msrb.gmra.mxu1 %vm62_vm0, %v563_v38 }
 0x758   :  { %v583_v40 = vpop.f32.mrf.mxu1 }
 0x759   :  { %v584_v42 = vadd.f32 %v1294_v0, %v583_v40 }
 0x75b   :  { %607 = vrot.lane.b32.xlu0 %v584_v42, %s1026_s27  ;;  %v586_v46 = vadd.f32 %v584_v42, %v355_v45  ;;  %v361_v42 = vadd.f32 %v1301_v3, %v1341_v6 }
 0x75d   :  { %v933_v47 = vmul.f32 -1.442695, %v586_v46 }
 0x75f   :  { %977 = vpow2.f32 %v933_v47 }
 0x765   :  { %v978_v48 = vpop.eup %977 }
 0x766   :  { %v590_v49 = vadd.f32 1.0, %v978_v48 }
 0x768   :  { %979 = vrcp.f32 %v590_v49  ;;  %v602_v55 = vand.u32 2147483648, %v590_v49  ;;  %vm596_vm14 = vweird.f32 %v590_v49  ;;  %v600_v56 = vand.u32 2147483647, %v590_v49 }
 0x76a   :  { %v603_v58 = vor.u32 1.1754944e-38, %v602_v55  ;;  %vm601_vm1 = vcmp.eq.f32.partialorder %v600_v56, 8.507059e+37 }
 0x76e   :  { %v980_v50 = vpop.eup %979 }
 0x76f   :  { %v592_v51 = vmul.f32 %v980_v50, %v590_v49  ;;  %vm597_vm13 = vweird.f32 %v980_v50 }
 0x770   :  { %vm598_vm15 = vmor %vm596_vm14, %vm597_vm13 }
 0x771   :  { %v593_v52 = vsub.f32 1.0, %v592_v51 }
 0x773   :  { %v594_v53 = vmul.f32 %v980_v50, %v593_v52 }
 0x775   :  { %v595_v54 = vadd.f32 %v980_v50, %v594_v53 }
 0x777   :  { %v599_v57 = vsel %vm598_vm15, %v980_v50, %v595_v54 }
 0x778   :  { %v604_v60 = vsel %vm601_vm1, %v603_v58, %v599_v57 }
 0x779   :  { %v617_v4 = vsub.f32 1.0, %v604_v60  ;;  %v623_v37 = vmul.f32 %v604_v60, %v560_v35 }
 0x7cd   :  { %v608_v59 = vpop.permute.xlu0 %607 }
 0x7ce   :  { %v610_v61 = vmul.f32 %v608_v59, %v604_v60  ;;  %v761_v60 = vld [vmem:[%s1446_s8 + $0x18] sm:$0xff] }
 0x7cf   :  { %781 = vmatpush.msra.mxu1 %v761_v60 }
 0x7d0   :  { %612 = vrot.lane.b32.xlu1 %v610_v61, %s1026_s27  ;;  %v760_v61 = vld [vmem:[%s1446_s8 + $0x10] sm:$0xff] }
 0x7d1   :  { %782 = vmatpush.msra.mxu1 %v760_v61 }
 0x842   :  { %v613_v62 = vpop.permute.xlu1 %612 }
 0x843   :  { %v615_v1 = vadd.f32 %v613_v62, %v355_v45  ;;  %v759_v62 = vld [vmem:[%s1446_s8 + $0x8] sm:$0xff] }
 0x844   :  { %783 = vmatpush.msra.mxu1 %v759_v62 }
 0x845   :  { %981 = vtanh.f32 %v615_v1 }
 0x84b   :  { %v982_v2 = vpop.eup %981 }
 0x84c   :  { %619 = vrot.lane.b32.xlu2 %v982_v2, %s1027_s6 }
 0x8a6   :  { %v620_v5 = vpop.permute.xlu2 %619 }
 0x8a7   :  { %v622_v39 = vmul.f32 %v620_v5, %v617_v4 }
 0x8a9   :  { %v624_v7 = vadd.f32 %v623_v37, %v622_v39  ;;  %v758_v39 = vld [vmem:[%s1446_s8] sm:$0xff] }
 0x8aa   :  { %784 = vmatpush.msra.mxu1 %v758_v39 }
 0x8ab   :  { %626 = vrot.lane.b32.xlu0 %v624_v7, %s1027_s6 }
 0x91d   :  { %v627_v8 = vpop.permute.xlu0 %626 }
 0x91e   :  { %934 = vmatmul.msk.f32.vlgmr.msrb.gmra.mxu2 %vm62_vm0, %v627_v8  ;;  %v952_v8 = vld [vmem:[%s1440_s2 + $0x7] ss:$0 sm:$0xff] }
 0x9a1   :  { %v647_v9 = vpop.f32.mrf.mxu2 }
 0x9a2   :  { %v648_v10 = vadd.f32 %v1294_v0, %v647_v9 }
 0x9a4   :  { %671 = vrot.lane.b32.xlu1 %v648_v10, %s1026_s27  ;;  %v650_v12 = vadd.f32 %v648_v10, %v358_v11 }
 0x9a6   :  { %v935_v13 = vmul.f32 -1.442695, %v650_v12 }
 0x9a8   :  { %983 = vpow2.f32 %v935_v13 }
 0x9ae   :  { %v984_v14 = vpop.eup %983 }
 0x9af   :  { %v654_v15 = vadd.f32 1.0, %v984_v14  ;;  %v955_v14 = vld [vmem:[%s1447_s9] ss:$0 sm:$0xff] }
 0x9b1   :  { %985 = vrcp.f32 %v654_v15  ;;  %v666_v21 = vand.u32 2147483648, %v654_v15  ;;  %vm660_vm3 = vweird.f32 %v654_v15  ;;  %v664_v22 = vand.u32 2147483647, %v654_v15 }
 0x9b3   :  { %v667_v24 = vor.u32 1.1754944e-38, %v666_v21  ;;  %vm665_vm5 = vcmp.eq.f32.partialorder %v664_v22, 8.507059e+37 }
 0x9b7   :  { %v986_v16 = vpop.eup %985 }
 0x9b8   :  { %v656_v17 = vmul.f32 %v986_v16, %v654_v15  ;;  %vm661_vm2 = vweird.f32 %v986_v16 }
 0x9b9   :  { %vm662_vm4 = vmor %vm660_vm3, %vm661_vm2 }
 0x9ba   :  { %v657_v18 = vsub.f32 1.0, %v656_v17 }
 0x9bc   :  { %v658_v19 = vmul.f32 %v986_v16, %v657_v18 }
 0x9be   :  { %v659_v20 = vadd.f32 %v986_v16, %v658_v19 }
 0x9c0   :  { %v663_v23 = vsel %vm662_vm4, %v986_v16, %v659_v20 }
 0x9c1   :  { %v668_v25 = vsel %vm665_vm5, %v667_v24, %v663_v23 }
 0x9c2   :  { %v681_v30 = vsub.f32 1.0, %v668_v25  ;;  %v687_v33 = vmul.f32 %v668_v25, %v624_v7  ;;  %v288_v7 = vadd.f32 %v1337_v41, %v1312_v32  ;;  %v1028_v41 = vmov 64.0  }
 0x9c4   :  { %v293_v9 = vadd.f32 %v952_v8, %v288_v7 }
 0x9c6   :  { %v294_v10 = vadd.f32 %v293_v9, %v1289_v63 }
 0xa16   :  { %v672_v43 = vpop.permute.xlu1 %671 }
 0xa17   :  { %v674_v26 = vmul.f32 %v672_v43, %v668_v25 }
 0xa19   :  { %676 = vrot.lane.b32.xlu2 %v674_v26, %s1026_s27  ;;  %v837_v26 = vld [vmem:[%s1450_s12 + $0x38] sm:$0xff] }
 0xa1a   :  { %853 = vmatpush.msra.mxu2 %v837_v26 }
 0xa73   :  { %v677_v27 = vpop.permute.xlu2 %676 }
 0xa74   :  { %v679_v28 = vadd.f32 %v677_v27, %v358_v11  ;;  %v295_v11 = vmul.f32 0.25, %v294_v10  ;;  %v836_v27 = vld [vmem:[%s1450_s12 + $0x30] sm:$0xff] }
 0xa75   :  { %854 = vmatpush.msra.mxu2 %v836_v27 }
 0xa76   :  { %987 = vtanh.f32 %v679_v28  ;;  %v835_v28 = vld [vmem:[%s1450_s12 + $0x28] sm:$0xff] }
 0xa77   :  { %855 = vmatpush.msra.mxu2 %v835_v28 }
 0xa7c   :  { %v988_v29 = vpop.eup %987 }
 0xa7d   :  { %683 = vrot.lane.b32.xlu0 %v988_v29, %s1027_s6  ;;  %v834_v29 = vld [vmem:[%s1450_s12 + $0x20] sm:$0xff] }
 0xa7e   :  { %856 = vmatpush.msra.mxu2 %v834_v29 }
 0xaef   :  { %v684_v31 = vpop.permute.xlu0 %683 }
 0xaf0   :  { %v686_v34 = vmul.f32 %v684_v31, %v681_v30  ;;  %v833_v30 = vld [vmem:[%s1450_s12 + $0x18] sm:$0xff]  ;;  %v832_v31 = vld [vmem:[%s1450_s12 + $0x10] sm:$0xff] }
 0xaf1   :  { %857 = vmatpush.msra.mxu2 %v833_v30 }
 0xaf2   :  { %v688_v35 = vadd.f32 %v687_v33, %v686_v34  ;;  %v831_v33 = vld [vmem:[%s1450_s12 + $0x8] sm:$0xff]  ;;  %v830_v34 = vld [vmem:[%s1450_s12] sm:$0xff] }
 0xaf3   :  { %858 = vmatpush.msra.mxu2 %v832_v31 }
 0xaf4   :  { %690 = vrot.lane.b32.xlu1 %v688_v35, %s1027_s6 }
 0xaf5   :  { %859 = vmatpush.msra.mxu2 %v831_v33 }
 0xaf7   :  { %860 = vmatpush.msra.mxu2 %v830_v34 }
 0xb66   :  { %v691_v36 = vpop.permute.xlu1 %690 }
 0xb67   :  { %936 = vmatmul.msk.f32.vlgmr.msra.gmra.mxu3 %vm62_vm0, %v691_v36 }
 0xbea   :  { %v711_v38 = vpop.f32.mrf.mxu3 }
 0xbeb   :  { %v712_v40 = vadd.f32 %v1294_v0, %v711_v38 }
 0xbed   :  { %735 = vrot.lane.b32.xlu2 %v712_v40, %s1026_s27  ;;  %v714_v44 = vadd.f32 %v712_v40, %v361_v42 }
 0xbef   :  { %v937_v45 = vmul.f32 -1.442695, %v714_v44 }
 0xbf1   :  { %989 = vpow2.f32 %v937_v45 }
 0xbf7   :  { %v990_v46 = vpop.eup %989 }
 0xbf8   :  { %v718_v47 = vadd.f32 1.0, %v990_v46 }
 0xbfa   :  { %991 = vrcp.f32 %v718_v47  ;;  %v730_v53 = vand.u32 2147483648, %v718_v47  ;;  %vm724_vm7 = vweird.f32 %v718_v47  ;;  %v728_v0 = vand.u32 2147483647, %v718_v47 }
 0xbfc   :  { %v731_v55 = vor.u32 1.1754944e-38, %v730_v53  ;;  %vm729_vm9 = vcmp.eq.f32.partialorder %v728_v0, 8.507059e+37 }
 0xc00   :  { %v992_v48 = vpop.eup %991 }
 0xc01   :  { %v720_v49 = vmul.f32 %v992_v48, %v718_v47  ;;  %vm725_vm6 = vweird.f32 %v992_v48 }
 0xc02   :  { %vm726_vm8 = vmor %vm724_vm7, %vm725_vm6 }
 0xc03   :  { %v721_v50 = vsub.f32 1.0, %v720_v49 }
 0xc05   :  { %v722_v51 = vmul.f32 %v992_v48, %v721_v50 }
 0xc07   :  { %v723_v52 = vadd.f32 %v992_v48, %v722_v51  ;;  %v957_v51 = vld [vmem:[%s1449_s11] ss:$0 sm:$0xff] }
 0xc09   :  { %v727_v54 = vsel %vm726_vm8, %v992_v48, %v723_v52  ;;  %v956_v48 = vld [vmem:[%s1448_s10] ss:$0 sm:$0xff] }
 0xc0a   :  { %v732_v6 = vsel %vm729_vm9, %v731_v55, %v727_v54  ;;  %v958_v54 = vld [vmem:[%s1451_s13] ss:$0 sm:$0xff] }
 0xc0b   :  { %v745_v1 = vsub.f32 1.0, %v732_v6  ;;  %v751_v4 = vmul.f32 %v732_v6, %v688_v35 }
 0xc47   :  { %v736_v3 = vpop.permute.xlu2 %735 }
 0xc48   :  { %v738_v56 = vmul.f32 %v736_v3, %v732_v6 }
 0xc4a   :  { %740 = vrot.lane.b32.xlu0 %v738_v56, %s1026_s27 }
 0xcbc   :  { %v741_v57 = vpop.permute.xlu0 %740 }
 0xcbd   :  { %v743_v58 = vadd.f32 %v741_v57, %v361_v42 }
 0xcbf   :  { %993 = vtanh.f32 %v743_v58 }
 0xcc0   :  { %995 = vrcp.f32 %v1028_v41 }
 0xcc5   :  { %v994_v59 = vpop.eup %993 }
 0xcc6   :  { %747 = vrot.lane.b32.xlu1 %v994_v59, %s1027_s6  ;;  %v996_v17 = vpop.eup %995 }
 0xcc7   :  { %v794_v18 = vmul.f32 64.0, %v996_v17  ;;  %vm798_vm11 = vweird.f32 %v996_v17 }
 0xcc9   :  { %v795_v63 = vsub.f32 1.0, %v794_v18 }
 0xccb   :  { %v796_v19 = vmul.f32 %v996_v17, %v795_v63 }
 0xccd   :  { %v797_v20 = vadd.f32 %v996_v17, %v796_v19 }
 0xccf   :  { %v799_v21 = vsel %vm798_vm11, %v996_v17, %v797_v20 }
 0xd38   :  { %v748_v2 = vpop.permute.xlu1 %747 }
 0xd39   :  { %v750_v5 = vmul.f32 %v748_v2, %v745_v1 }
 0xd3b   :  { %v752_v37 = vadd.f32 %v751_v4, %v750_v5 }
 0xd3d   :  { %754 = vrot.lane.b32.xlu2 %v752_v37, %s1027_s6 }
 0xd97   :  { %v755_v12 = vpop.permute.xlu2 %754 }
 0xd98   :  { %v757_v13 = vadd.f32 %v755_v12, %v295_v11 }
 0xd9a   :  { %938 = vmatmul.msk.f32.vlgmr.msra.gmra.mxu1 %vm62_vm0, %v757_v13 }
 0xe17   :  { %v786_v15 = vpop.f32.mrf.mxu1 }
 0xe18   :  { %v787_v16 = vadd.f32 %v955_v14, %v786_v15 }
 0xe1a   :  { %v790_v32 = vsel %vm789_vm10, %v787_v16, 0.0 }
 0xe1b   :  { %791 = vadd.xlane.f32.xlu0 %v790_v32 }
 0xe8e   :  { %v792_v22 = vpop.xlane.xlu0 %791 }
 0xe8f   :  { %v800_v23 = vmul.f32 %v799_v21, %v792_v22 }
 0xe91   :  { %v801_v24 = vsub.f32 %v787_v16, %v800_v23 }
 0xe93   :  { %v802_v43 = vmul.f32 %v801_v24, %v801_v24 }
 0xe95   :  { %v803_v25 = vsel %vm789_vm10, %v802_v43, 0.0 }
 0xe96   :  { %804 = vadd.xlane.f32.xlu1 %v803_v25 }
 0xf09   :  { %v805_v35 = vpop.xlane.xlu1 %804 }
 0xf0a   :  { %v806_v36 = vmul.f32 %v805_v35, %v799_v21 }
 0xf0c   :  { %v807_v38 = vadd.f32 1e-05, %v806_v36 }
 0xf0e   :  { %997 = vrsqrt.f32 %v807_v38  ;;  %vm814_vm13 = vweird.f32 %v807_v38 }
 0xf14   :  { %v998_v40 = vpop.eup %997 }
 0xf15   :  { %v809_v42 = vmul.f32 %v998_v40, %v807_v38  ;;  %vm815_vm12 = vweird.f32 %v998_v40 }
 0xf16   :  { %vm816_vm14 = vmor %vm814_vm13, %vm815_vm12 }
 0xf17   :  { %v810_v44 = vmul.f32 %v998_v40, %v809_v42 }
 0xf19   :  { %v811_v45 = vmul.f32 0.5, %v810_v44 }
 0xf1b   :  { %v812_v46 = vsub.f32 1.5, %v811_v45 }
 0xf1d   :  { %v813_v47 = vmul.f32 %v998_v40, %v812_v46 }
 0xf1f   :  { %v817_v49 = vsel %vm816_vm14, %v998_v40, %v813_v47 }
 0xf20   :  { %v818_v50 = vmul.f32 %v817_v49, %v801_v24 }
 0xf22   :  { %v823_v52 = vmul.f32 %v956_v48, %v818_v50 }
 0xf24   :  { %v828_v53 = vadd.f32 %v957_v51, %v823_v52 }
 0xf26   :  { %v829_v0 = vmax.f32 %v828_v53, 0.0 }
 0xf28   :  { %939 = vmatmul.msk.f32.vlgmr.msra.gmra.mxu2 %vm789_vm10, %v829_v0 }
 0xfab   :  { %v862_v55 = vpop.f32.mrf.mxu2 }
 0xfac   :  { %v863_v3 = vadd.f32 %v958_v54, %v862_v55 }
 0xfae   :  { %865 = vst.msk [vmem:[#allocation2] sm:$0xff] %vm62_vm0, %v863_v3 }
 0xfaf   :  { %876 = dma.vmem_to_hbm [thread:$0]  %s872_s1, 128, %s874_s28, [#allocation3]  }
 0xfb0   :  { %1023 = dma.done.wait [#allocation3], 128  }
 0xfb1   :  { %1024 = vsyncadd [#allocation3], 4294967168 }
 0xfb2   :  { %881 = vsyncpa [#allocation3], 1 }

</bundles_post_ra>
